<compile_context>
chip_gen: v7x
topology: tpu7x:2x2x1
jax: 0.10.0
libtpu: 0.0.40
codegen_flags: <defaults>
</compile_context>

<pallas_src>
import functools

import jax
import jax.numpy as jnp
from jax.experimental import pallas as pl
from jax.experimental.pallas import tpu as pltpu

LEAKY_SLOPE = 0.2


# --------------------------------------------------------------- phase-stacking glue (XLA side)
def _stack_phases(x):
    """x: (N, C, H, W) bf16, channels-first -> lane-dense stacked stride-2 phase tensors.

    Returns (e, o, o_rolled) each (N, 3C, M), M = (H/2)*(W/2) on the lane axis. The 3C channel
    stacking order is [col-rolled odd-col phase, even-col phase, odd-col phase] = dj 0,1,2.
      e        : even input rows (row 2*oi)                     -> taps di = 1
      o        : odd  input rows (row 2*oi + 1)                 -> taps di = 2
      o_rolled : odd rows rolled down by one output row (2*oi-1, circular) -> taps di = 0
    """
    n, c, h, w = x.shape
    assert h % 2 == 0 and w % 2 == 0
    ho, wo = h // 2, w // 2
    ee = x[:, :, 0::2, 0::2]
    eo = x[:, :, 0::2, 1::2]
    oe = x[:, :, 1::2, 0::2]
    oo = x[:, :, 1::2, 1::2]
    eom = jnp.roll(eo, 1, axis=3)                       # column wrap: col j -> (j-1) mod Wo
    oom = jnp.roll(oo, 1, axis=3)
    e_stack = jnp.concatenate([eom, ee, eo], axis=1)    # (N, 3C, Ho, Wo), dj-major channels
    o_stack = jnp.concatenate([oom, oe, oo], axis=1)
    # TODO(synk): the extra pre-rolled odd copy costs ~17% more activation read; an in-kernel
    # pltpu.roll of the di=0 partial sum would remove it (kept wrapper-side for robust lowering
    # of sub-128-lane tiles and to keep spatial tiling trivially correct).
    o_roll = jnp.roll(o_stack, 1, axis=2)               # row wrap: row r -> (r-1) mod Ho
    m = ho * wo

    def flat(t):
        return t.reshape(n, 3 * c, m)

    return flat(e_stack), flat(o_stack), flat(o_roll), (n, ho, wo)


def _pick_block_m(m):
    """Largest lane-aligned (multiple of 128) spatial tile giving >= 2 grid steps when possible."""
    bm = m
    while bm % 256 == 0 and (bm > 2048 or bm == m):
        bm //= 2
    return bm


# ------------------------------------------------------------------------------- conv kernel
def _conv3x3s2_kernel(e_ref, o_ref, or_ref, w_ref, out_ref, *, act):
    """3x3 stride-2 circular conv block: 3 stacked-tap matmuls, value accumulation, fused act.

    e/o/or refs: (1, 3*Cin, BM) bf16.  w_ref: (3, Cout, 3*Cin) bf16, slab t = kernel row di.
    """
    acc = jnp.dot(w_ref[0], or_ref[0], preferred_element_type=jnp.float32)   # di=0 (row-1, wrap)
    acc = acc + jnp.dot(w_ref[1], e_ref[0], preferred_element_type=jnp.float32)   # di=1
    acc = acc + jnp.dot(w_ref[2], o_ref[0], preferred_element_type=jnp.float32)   # di=2
    if act == "leaky":
        acc = jnp.where(acc > 0, acc, LEAKY_SLOPE * acc)                    # f32 epilogue
    out_ref[0] = acc.astype(out_ref.dtype)


def periodic_conv3x3_s2(x, w_stack, act, out_dtype=jnp.bfloat16):
    """PeriodicConv2D(cin, cout, 3, 2, bias=False) with fused LeakyReLU.

    x: (N, Cin, H, W) bf16 channels-first; w_stack: (3, Cout, 3*Cin) bf16.
    Returns (N, Cout, H/2, W/2).
    """
    e, o, orow, (n, ho, wo) = _stack_phases(x)
    c3 = e.shape[1]
    m = ho * wo
    cout = w_stack.shape[1]
    bm = _pick_block_m(m)

    act_spec = pl.BlockSpec((1, c3, bm), lambda i, j: (i, 0, j))
    in_bytes = 3 * n * c3 * m * 2 + 3 * cout * c3 * 2
    out_bytes = n * cout * m * jnp.dtype(out_dtype).itemsize

    out = pl.pallas_call(
        functools.partial(_conv3x3s2_kernel, act=act),
        out_shape=jax.ShapeDtypeStruct((n, cout, m), out_dtype),
        grid=(n, m // bm),
        in_specs=[act_spec, act_spec, act_spec,
                  pl.BlockSpec((3, cout, c3), lambda i, j: (0, 0, 0))],
        out_specs=pl.BlockSpec((1, cout, bm), lambda i, j: (i, 0, j)),
        compiler_params=pltpu.CompilerParams(
            dimension_semantics=("parallel", "parallel")),
        cost_estimate=pl.CostEstimate(
            flops=2 * n * m * cout * 3 * c3,
            transcendentals=0,
            bytes_accessed=int(in_bytes + out_bytes)),
    )(e, o, orow, w_stack)
    return out.reshape(n, cout, ho, wo)


# ----------------------------------------------------- fused layer-4 conv + MinibatchStdDev tail
def _conv4_tail_kernel(e_ref, o_ref, or_ref, w4_ref, wmain_ref, wstd_ref, out_ref, *, n):
    """Whole batch in one block: conv4 -> mbstd -> LeakyReLU -> 4x4 conv -> sigmoid."""
    w0, w1, w2 = w4_ref[0], w4_ref[1], w4_ref[2]                 # (hd, 3*Cin) bf16
    ys = []
    for i in range(n):                                           # static unroll over the batch
        y = jnp.dot(w0, or_ref[i], preferred_element_type=jnp.float32)
        y = y + jnp.dot(w1, e_ref[i], preferred_element_type=jnp.float32)
        y = y + jnp.dot(w2, o_ref[i], preferred_element_type=jnp.float32)
        ys.append(y)                                             # (hd, 16) f32 pre-activation

    # MinibatchStdDev: biased per-location variance over the batch, averaged to one scalar.
    mean = sum(ys) / n
    var = sum((y - mean) ** 2 for y in ys) / n
    std_s = jnp.mean(jnp.sqrt(var + 1e-8), keepdims=True)        # (1, 1)

    wmain = wmain_ref[...]                                       # (hd, 16) f32
    wstd = wstd_ref[...]                                         # (1, 1)  f32
    row = jax.lax.broadcasted_iota(jnp.int32, (n, 1), 0)
    lg = jnp.zeros((n, 1), jnp.float32)
    for i, y in enumerate(ys):
        yl = jnp.where(y > 0, y, LEAKY_SLOPE * y)                # LeakyReLU AFTER mbstd
        li = jnp.sum(yl * wmain, keepdims=True)                  # (1, 1) per-sample logit
        lg = jnp.where(row == i, li, lg)
    # std channel is spatially constant and >= 0 (LeakyReLU identity): fold as std*sum(w5_std).
    lg = lg + std_s * wstd
    out_ref[...] = 1.0 / (1.0 + jnp.exp(-lg))


def conv4_tail_fused(x, w4_stack, w5_main, w5_std):
    """x: (N, hd/2, 8, 8) bf16 -> (N, 1) f32 discriminator scores."""
    e, o, orow, (n, ho, wo) = _stack_phases(x)
    # TODO(synk): the fused tail assumes the final feature map is exactly 4x4 (img_size = 64);
    # larger spatial extents need a small sliding-window variant of this kernel.
    assert ho == 4 and wo == 4
    c3 = e.shape[1]
    hd = w4_stack.shape[1]
    return pl.pallas_call(
        functools.partial(_conv4_tail_kernel, n=n),
        out_shape=jax.ShapeDtypeStruct((n, 1), jnp.float32),
        in_specs=[pl.BlockSpec(memory_space=pltpu.MemorySpace.VMEM)] * 6,
        out_specs=pl.BlockSpec(memory_space=pltpu.MemorySpace.VMEM),
        cost_estimate=pl.CostEstimate(
            flops=2 * n * 16 * hd * 3 * c3 + 10 * n * hd * 16,
            transcendentals=n + n * hd * 16,
            bytes_accessed=int(3 * n * c3 * 16 * 2 + 3 * hd * c3 * 2 + hd * 16 * 4 + 4 + n * 4)),
    )(e, o, orow, w4_stack, w5_main, w5_std)


# ----------------------------------------------------------------------------- params / forward
def _pack_conv_w(w):
    """PyTorch conv weight (Cout, Cin, 3, 3) -> (3, Cout, 3*Cin) bf16, slab t = kernel row di,
    contraction index = dj*Cin + cin (matches the [dj=0, dj=1, dj=2] activation stacking)."""
    cout, cin, kh, kw = w.shape
    assert kh == 3 and kw == 3
    return jnp.transpose(w, (2, 0, 3, 1)).reshape(kh, cout, kw * cin).astype(jnp.bfloat16)


def pack_params(params):
    """Precompute kernel-ready weights once (hoisted out of the jitted forward path)."""
    hd = params["w5"].shape[1] - 1
    w5 = params["w5"].astype(jnp.float32)
    return {
        "w1": _pack_conv_w(params["w1"]),
        "w2": _pack_conv_w(params["w2"]),
        "w3": _pack_conv_w(params["w3"]),
        "w4": _pack_conv_w(params["w4"]),
        "w5_main": w5[0, :hd].reshape(hd, 16),            # (hd, 16), index (c, i*4+j)
        "w5_std": jnp.sum(w5[0, hd]).reshape(1, 1),        # mbstd channel contribution
    }


def discriminator_forward(x_nchw, packed):
    # TODO(synk): the stride-2 phase extraction (slices/rolls/concats) stays as XLA glue
    # between pallas_calls; fold into the kernels with manual DMA gathers if it shows at scale.
    x = x_nchw.astype(jnp.bfloat16)                        # one cast, channels-first throughout
    x = periodic_conv3x3_s2(x, packed["w1"], act="leaky")
    x = periodic_conv3x3_s2(x, packed["w2"], act="leaky")
    x = periodic_conv3x3_s2(x, packed["w3"], act="leaky")
    out = conv4_tail_fused(x, packed["w4"], packed["w5_main"], packed["w5_std"])
    return out.reshape(-1, 1, 1, 1)                        # NCHW (N, 1, 1, 1)


def init_params(key, nc, hd):
    ks = jax.random.split(key, 5)

    def w(k, shape):
        return 0.05 * jax.random.normal(k, shape, dtype=jnp.float32)

    return {
        "w1": w(ks[0], (hd // 8, nc, 3, 3)),
        "w2": w(ks[1], (hd // 4, hd // 8, 3, 3)),
        "w3": w(ks[2], (hd // 2, hd // 4, 3, 3)),
        "w4": w(ks[3], (hd, hd // 2, 3, 3)),
        "w5": w(ks[4], (1, hd + 1, 4, 4)),
    }


# --------------------------------------------------------------------------- plain-XLA reference
def reference_forward(x_nchw, params):
    """f32 reference implementing the same module semantics (for a loose numerical check)."""
    def leaky(v):
        return jnp.where(v > 0, v, LEAKY_SLOPE * v)

    def pconv(v, wgt, stride):
        vp = jnp.pad(v, ((0, 0), (0, 0), (1, 1), (1, 1)), mode="wrap")
        return jax.lax.conv_general_dilated(vp, wgt, (stride, stride), "VALID",
                                            dimension_numbers=("NCHW", "OIHW", "NCHW"))

    x = x_nchw.astype(jnp.float32)
    x = leaky(pconv(x, params["w1"], 2))
    x = leaky(pconv(x, params["w2"], 2))
    x = leaky(pconv(x, params["w3"], 2))
    x = pconv(x, params["w4"], 2)
    n, c, h, w = x.shape
    mean = jnp.mean(x, axis=0, keepdims=True)
    std = jnp.sqrt(jnp.mean((x - mean) ** 2, axis=0, keepdims=True) + 1e-8)
    s = jnp.mean(std)
    x = jnp.concatenate([x, jnp.full((n, 1, h, w), s, dtype=x.dtype)], axis=1)
    x = leaky(x)
    x = jax.lax.conv_general_dilated(x, params["w5"], (1, 1), "VALID",
                                     dimension_numbers=("NCHW", "OIHW", "NCHW"))
    return 1.0 / (1.0 + jnp.exp(-x))


if __name__ == "__main__":
    # Smallest shapes consistent with the module: after 4 stride-2 convs the spatial size must
    # be exactly 4 for the final 4x4 valid conv to give a 1x1 map, so img_size = 64.
    batch, nc, img_size, hd = 2, 3, 64, 32
    key = jax.random.PRNGKey(0)
    k_x, k_p = jax.random.split(key)
    x = jax.random.normal(k_x, (batch, nc, img_size, img_size), dtype=jnp.float32)
    params = init_params(k_p, nc, hd)
    packed = pack_params(params)           # weight packing hoisted out of the per-forward path

    out = jax.jit(discriminator_forward)(x, packed)
    out = jax.block_until_ready(out)

    assert out.shape == (batch, 1, 1, 1), out.shape
    assert bool(jnp.all((out >= 0.0) & (out <= 1.0)))              # sigmoid range sanity check

    ref = reference_forward(x, params)                             # loose check vs plain XLA (f32)
    max_err = float(jnp.max(jnp.abs(out - ref)))
    assert max_err < 2e-2, max_err                                 # bf16 MXU inputs => small diff

    print("KERNEL_OK")
</pallas_src>

<mosaic_0001>
module attributes {stable_mosaic.version = 11 : i64} {
  func.func @_conv3x3s2_kernel(%arg0: i32, %arg1: i32, %arg2: memref<1x9x512xbf16, #tpu.memory_space<vmem>>, %arg3: memref<1x9x512xbf16, #tpu.memory_space<vmem>>, %arg4: memref<1x9x512xbf16, #tpu.memory_space<vmem>>, %arg5: memref<3x4x9xbf16, #tpu.memory_space<vmem>>, %arg6: memref<1x4x512xbf16, #tpu.memory_space<vmem>>) attributes {dimension_semantics = [#tpu.dimension_semantics<parallel>, #tpu.dimension_semantics<parallel>], iteration_bounds = array<i64: 2, 2>, scalar_prefetch = 0 : i64, scratch_operands = 0 : i64, tpu.core_type = #tpu.core_type<tc>, window_params = [{transform_indices = @transform_0, window_bounds = array<i64: 1, 9, 512>}, {transform_indices = @transform_1, window_bounds = array<i64: 1, 9, 512>}, {transform_indices = @transform_2, window_bounds = array<i64: 1, 9, 512>}, {pipeline_mode = #tpu.pipeline_mode<synchronous>, transform_indices = @transform_3, window_bounds = array<i64: 3, 4, 9>}, {transform_indices = @transform_4, window_bounds = array<i64: 1, 4, 512>}]} {
    %c0 = arith.constant 0 : index
    %c0_0 = arith.constant 0 : index
    %c0_1 = arith.constant 0 : index
    %0 = vector.load %arg5[%c0, %c0_0, %c0_1] : memref<3x4x9xbf16, #tpu.memory_space<vmem>>, vector<1x4x9xbf16>
    %1 = vector.shape_cast %0 : vector<1x4x9xbf16> to vector<4x9xbf16>
    %c0_2 = arith.constant 0 : index
    %c0_3 = arith.constant 0 : index
    %c0_4 = arith.constant 0 : index
    %2 = vector.load %arg4[%c0_2, %c0_3, %c0_4] : memref<1x9x512xbf16, #tpu.memory_space<vmem>>, vector<1x9x512xbf16>
    %3 = vector.shape_cast %2 : vector<1x9x512xbf16> to vector<9x512xbf16>
    %cst = arith.constant dense<0.000000e+00> : vector<4x512xf32>
    %4 = tpu.matmul %1, %3, %cst {dimension_numbers = #tpu.dot_dimension_numbers<[1], [0], [0], [1], [0, 0, 1, 1], [], []>} : vector<4x9xbf16>, vector<9x512xbf16>, vector<4x512xf32> -> vector<4x512xf32>
    %c1 = arith.constant 1 : index
    %c0_5 = arith.constant 0 : index
    %c0_6 = arith.constant 0 : index
    %5 = vector.load %arg5[%c1, %c0_5, %c0_6] : memref<3x4x9xbf16, #tpu.memory_space<vmem>>, vector<1x4x9xbf16>
    %6 = vector.shape_cast %5 : vector<1x4x9xbf16> to vector<4x9xbf16>
    %c0_7 = arith.constant 0 : index
    %c0_8 = arith.constant 0 : index
    %c0_9 = arith.constant 0 : index
    %7 = vector.load %arg2[%c0_7, %c0_8, %c0_9] : memref<1x9x512xbf16, #tpu.memory_space<vmem>>, vector<1x9x512xbf16>
    %8 = vector.shape_cast %7 : vector<1x9x512xbf16> to vector<9x512xbf16>
    %cst_10 = arith.constant dense<0.000000e+00> : vector<4x512xf32>
    %9 = tpu.matmul %6, %8, %cst_10 {dimension_numbers = #tpu.dot_dimension_numbers<[1], [0], [0], [1], [0, 0, 1, 1], [], []>} : vector<4x9xbf16>, vector<9x512xbf16>, vector<4x512xf32> -> vector<4x512xf32>
    %10 = arith.addf %4, %9 : vector<4x512xf32>
    %c2 = arith.constant 2 : index
    %c0_11 = arith.constant 0 : index
    %c0_12 = arith.constant 0 : index
    %11 = vector.load %arg5[%c2, %c0_11, %c0_12] : memref<3x4x9xbf16, #tpu.memory_space<vmem>>, vector<1x4x9xbf16>
    %12 = vector.shape_cast %11 : vector<1x4x9xbf16> to vector<4x9xbf16>
    %c0_13 = arith.constant 0 : index
    %c0_14 = arith.constant 0 : index
    %c0_15 = arith.constant 0 : index
    %13 = vector.load %arg3[%c0_13, %c0_14, %c0_15] : memref<1x9x512xbf16, #tpu.memory_space<vmem>>, vector<1x9x512xbf16>
    %14 = vector.shape_cast %13 : vector<1x9x512xbf16> to vector<9x512xbf16>
    %cst_16 = arith.constant dense<0.000000e+00> : vector<4x512xf32>
    %15 = tpu.matmul %12, %14, %cst_16 {dimension_numbers = #tpu.dot_dimension_numbers<[1], [0], [0], [1], [0, 0, 1, 1], [], []>} : vector<4x9xbf16>, vector<9x512xbf16>, vector<4x512xf32> -> vector<4x512xf32>
    %16 = arith.addf %10, %15 : vector<4x512xf32>
    %cst_17 = arith.constant 0.000000e+00 : f32
    %17 = vector.broadcast %cst_17 : f32 to vector<4x512xf32>
    %18 = arith.cmpf ogt, %16, %17 : vector<4x512xf32>
    %cst_18 = arith.constant 2.000000e-01 : f32
    %19 = vector.broadcast %cst_18 : f32 to vector<4x512xf32>
    %20 = arith.mulf %19, %16 : vector<4x512xf32>
    %21 = arith.select %18, %16, %20 : vector<4x512xi1>, vector<4x512xf32>
    %22 = arith.truncf %21 : vector<4x512xf32> to vector<4x512xbf16>
    %c0_19 = arith.constant 0 : index
    %c0_20 = arith.constant 0 : index
    %c0_21 = arith.constant 0 : index
    %23 = vector.load %arg6[%c0_19, %c0_20, %c0_21] : memref<1x4x512xbf16, #tpu.memory_space<vmem>>, vector<1x4x512xbf16>
    %24 = vector.shape_cast %23 : vector<1x4x512xbf16> to vector<4x512xbf16>
    %25 = vector.shape_cast %22 : vector<4x512xbf16> to vector<1x4x512xbf16>
    tpu.vector_store %arg6[%c0_19, %c0_20, %c0_21], %25 {strides = array<i32>} : memref<1x4x512xbf16, #tpu.memory_space<vmem>>, vector<1x4x512xbf16>,
    return
  }
  func.func @transform_0(%arg0: i32, %arg1: i32) -> (i32, i32, i32) {
    %c0_i32 = arith.constant 0 : i32
    %c0_i32_0 = arith.constant 0 : i32
    return %arg0, %c0_i32, %arg1 : i32, i32, i32
  }
  func.func @transform_1(%arg0: i32, %arg1: i32) -> (i32, i32, i32) {
    %c0_i32 = arith.constant 0 : i32
    %c0_i32_0 = arith.constant 0 : i32
    return %arg0, %c0_i32, %arg1 : i32, i32, i32
  }
  func.func @transform_2(%arg0: i32, %arg1: i32) -> (i32, i32, i32) {
    %c0_i32 = arith.constant 0 : i32
    %c0_i32_0 = arith.constant 0 : i32
    return %arg0, %c0_i32, %arg1 : i32, i32, i32
  }
  func.func @transform_3(%arg0: i32, %arg1: i32) -> (i32, i32, i32) {
    %c0_i32 = arith.constant 0 : i32
    %c0_i32_0 = arith.constant 0 : i32
    %c0_i32_1 = arith.constant 0 : i32
    %c0_i32_2 = arith.constant 0 : i32
    return %c0_i32, %c0_i32_0, %c0_i32_1 : i32, i32, i32
  }
  func.func @transform_4(%arg0: i32, %arg1: i32) -> (i32, i32, i32) {
    %c0_i32 = arith.constant 0 : i32
    %c0_i32_0 = arith.constant 0 : i32
    return %arg0, %c0_i32, %arg1 : i32, i32, i32
  }
}

module attributes {stable_mosaic.version = 11 : i64} {
  func.func @_conv3x3s2_kernel(%arg0: i32, %arg1: i32, %arg2: memref<1x12x128xbf16, #tpu.memory_space<vmem>>, %arg3: memref<1x12x128xbf16, #tpu.memory_space<vmem>>, %arg4: memref<1x12x128xbf16, #tpu.memory_space<vmem>>, %arg5: memref<3x8x12xbf16, #tpu.memory_space<vmem>>, %arg6: memref<1x8x128xbf16, #tpu.memory_space<vmem>>) attributes {dimension_semantics = [#tpu.dimension_semantics<parallel>, #tpu.dimension_semantics<parallel>], iteration_bounds = array<i64: 2, 2>, scalar_prefetch = 0 : i64, scratch_operands = 0 : i64, tpu.core_type = #tpu.core_type<tc>, window_params = [{transform_indices = @transform_0, window_bounds = array<i64: 1, 12, 128>}, {transform_indices = @transform_1, window_bounds = array<i64: 1, 12, 128>}, {transform_indices = @transform_2, window_bounds = array<i64: 1, 12, 128>}, {pipeline_mode = #tpu.pipeline_mode<synchronous>, transform_indices = @transform_3, window_bounds = array<i64: 3, 8, 12>}, {transform_indices = @transform_4, window_bounds = array<i64: 1, 8, 128>}]} {
    %c0 = arith.constant 0 : index
    %c0_0 = arith.constant 0 : index
    %c0_1 = arith.constant 0 : index
    %0 = vector.load %arg5[%c0, %c0_0, %c0_1] : memref<3x8x12xbf16, #tpu.memory_space<vmem>>, vector<1x8x12xbf16>
    %1 = vector.shape_cast %0 : vector<1x8x12xbf16> to vector<8x12xbf16>
    %c0_2 = arith.constant 0 : index
    %c0_3 = arith.constant 0 : index
    %c0_4 = arith.constant 0 : index
    %2 = vector.load %arg4[%c0_2, %c0_3, %c0_4] : memref<1x12x128xbf16, #tpu.memory_space<vmem>>, vector<1x12x128xbf16>
    %3 = vector.shape_cast %2 : vector<1x12x128xbf16> to vector<12x128xbf16>
    %cst = arith.constant dense<0.000000e+00> : vector<8x128xf32>
    %4 = tpu.matmul %1, %3, %cst {dimension_numbers = #tpu.dot_dimension_numbers<[1], [0], [0], [1], [0, 0, 1, 1], [], []>} : vector<8x12xbf16>, vector<12x128xbf16>, vector<8x128xf32> -> vector<8x128xf32>
    %c1 = arith.constant 1 : index
    %c0_5 = arith.constant 0 : index
    %c0_6 = arith.constant 0 : index
    %5 = vector.load %arg5[%c1, %c0_5, %c0_6] : memref<3x8x12xbf16, #tpu.memory_space<vmem>>, vector<1x8x12xbf16>
    %6 = vector.shape_cast %5 : vector<1x8x12xbf16> to vector<8x12xbf16>
    %c0_7 = arith.constant 0 : index
    %c0_8 = arith.constant 0 : index
    %c0_9 = arith.constant 0 : index
    %7 = vector.load %arg2[%c0_7, %c0_8, %c0_9] : memref<1x12x128xbf16, #tpu.memory_space<vmem>>, vector<1x12x128xbf16>
    %8 = vector.shape_cast %7 : vector<1x12x128xbf16> to vector<12x128xbf16>
    %cst_10 = arith.constant dense<0.000000e+00> : vector<8x128xf32>
    %9 = tpu.matmul %6, %8, %cst_10 {dimension_numbers = #tpu.dot_dimension_numbers<[1], [0], [0], [1], [0, 0, 1, 1], [], []>} : vector<8x12xbf16>, vector<12x128xbf16>, vector<8x128xf32> -> vector<8x128xf32>
    %10 = arith.addf %4, %9 : vector<8x128xf32>
    %c2 = arith.constant 2 : index
    %c0_11 = arith.constant 0 : index
    %c0_12 = arith.constant 0 : index
    %11 = vector.load %arg5[%c2, %c0_11, %c0_12] : memref<3x8x12xbf16, #tpu.memory_space<vmem>>, vector<1x8x12xbf16>
    %12 = vector.shape_cast %11 : vector<1x8x12xbf16> to vector<8x12xbf16>
    %c0_13 = arith.constant 0 : index
    %c0_14 = arith.constant 0 : index
    %c0_15 = arith.constant 0 : index
    %13 = vector.load %arg3[%c0_13, %c0_14, %c0_15] : memref<1x12x128xbf16, #tpu.memory_space<vmem>>, vector<1x12x128xbf16>
    %14 = vector.shape_cast %13 : vector<1x12x128xbf16> to vector<12x128xbf16>
    %cst_16 = arith.constant dense<0.000000e+00> : vector<8x128xf32>
    %15 = tpu.matmul %12, %14, %cst_16 {dimension_numbers = #tpu.dot_dimension_numbers<[1], [0], [0], [1], [0, 0, 1, 1], [], []>} : vector<8x12xbf16>, vector<12x128xbf16>, vector<8x128xf32> -> vector<8x128xf32>
    %16 = arith.addf %10, %15 : vector<8x128xf32>
    %cst_17 = arith.constant 0.000000e+00 : f32
    %17 = vector.broadcast %cst_17 : f32 to vector<8x128xf32>
    %18 = arith.cmpf ogt, %16, %17 : vector<8x128xf32>
    %cst_18 = arith.constant 2.000000e-01 : f32
    %19 = vector.broadcast %cst_18 : f32 to vector<8x128xf32>
    %20 = arith.mulf %19, %16 : vector<8x128xf32>
    %21 = arith.select %18, %16, %20 : vector<8x128xi1>, vector<8x128xf32>
    %22 = arith.truncf %21 : vector<8x128xf32> to vector<8x128xbf16>
    %c0_19 = arith.constant 0 : index
    %c0_20 = arith.constant 0 : index
    %c0_21 = arith.constant 0 : index
    %23 = vector.load %arg6[%c0_19, %c0_20, %c0_21] : memref<1x8x128xbf16, #tpu.memory_space<vmem>>, vector<1x8x128xbf16>
    %24 = vector.shape_cast %23 : vector<1x8x128xbf16> to vector<8x128xbf16>
    %25 = vector.shape_cast %22 : vector<8x128xbf16> to vector<1x8x128xbf16>
    tpu.vector_store %arg6[%c0_19, %c0_20, %c0_21], %25 {strides = array<i32>} : memref<1x8x128xbf16, #tpu.memory_space<vmem>>, vector<1x8x128xbf16>,
    return
  }
  func.func @transform_0(%arg0: i32, %arg1: i32) -> (i32, i32, i32) {
    %c0_i32 = arith.constant 0 : i32
    %c0_i32_0 = arith.constant 0 : i32
    return %arg0, %c0_i32, %arg1 : i32, i32, i32
  }
  func.func @transform_1(%arg0: i32, %arg1: i32) -> (i32, i32, i32) {
    %c0_i32 = arith.constant 0 : i32
    %c0_i32_0 = arith.constant 0 : i32
    return %arg0, %c0_i32, %arg1 : i32, i32, i32
  }
  func.func @transform_2(%arg0: i32, %arg1: i32) -> (i32, i32, i32) {
    %c0_i32 = arith.constant 0 : i32
    %c0_i32_0 = arith.constant 0 : i32
    return %arg0, %c0_i32, %arg1 : i32, i32, i32
  }
  func.func @transform_3(%arg0: i32, %arg1: i32) -> (i32, i32, i32) {
    %c0_i32 = arith.constant 0 : i32
    %c0_i32_0 = arith.constant 0 : i32
    %c0_i32_1 = arith.constant 0 : i32
    %c0_i32_2 = arith.constant 0 : i32
    return %c0_i32, %c0_i32_0, %c0_i32_1 : i32, i32, i32
  }
  func.func @transform_4(%arg0: i32, %arg1: i32) -> (i32, i32, i32) {
    %c0_i32 = arith.constant 0 : i32
    %c0_i32_0 = arith.constant 0 : i32
    return %arg0, %c0_i32, %arg1 : i32, i32, i32
  }
}

module attributes {stable_mosaic.version = 11 : i64} {
  func.func @_conv3x3s2_kernel(%arg0: i32, %arg1: i32, %arg2: memref<1x24x64xbf16, #tpu.memory_space<vmem>>, %arg3: memref<1x24x64xbf16, #tpu.memory_space<vmem>>, %arg4: memref<1x24x64xbf16, #tpu.memory_space<vmem>>, %arg5: memref<3x16x24xbf16, #tpu.memory_space<vmem>>, %arg6: memref<1x16x64xbf16, #tpu.memory_space<vmem>>) attributes {dimension_semantics = [#tpu.dimension_semantics<parallel>, #tpu.dimension_semantics<parallel>], iteration_bounds = array<i64: 2, 1>, scalar_prefetch = 0 : i64, scratch_operands = 0 : i64, tpu.core_type = #tpu.core_type<tc>, window_params = [{transform_indices = @transform_0, window_bounds = array<i64: 1, 24, 64>}, {transform_indices = @transform_1, window_bounds = array<i64: 1, 24, 64>}, {transform_indices = @transform_2, window_bounds = array<i64: 1, 24, 64>}, {pipeline_mode = #tpu.pipeline_mode<synchronous>, transform_indices = @transform_3, window_bounds = array<i64: 3, 16, 24>}, {transform_indices = @transform_4, window_bounds = array<i64: 1, 16, 64>}]} {
    %c0 = arith.constant 0 : index
    %c0_0 = arith.constant 0 : index
    %c0_1 = arith.constant 0 : index
    %0 = vector.load %arg5[%c0, %c0_0, %c0_1] : memref<3x16x24xbf16, #tpu.memory_space<vmem>>, vector<1x16x24xbf16>
    %1 = vector.shape_cast %0 : vector<1x16x24xbf16> to vector<16x24xbf16>
    %c0_2 = arith.constant 0 : index
    %c0_3 = arith.constant 0 : index
    %c0_4 = arith.constant 0 : index
    %2 = vector.load %arg4[%c0_2, %c0_3, %c0_4] : memref<1x24x64xbf16, #tpu.memory_space<vmem>>, vector<1x24x64xbf16>
    %3 = vector.shape_cast %2 : vector<1x24x64xbf16> to vector<24x64xbf16>
    %cst = arith.constant dense<0.000000e+00> : vector<16x64xf32>
    %4 = tpu.matmul %1, %3, %cst {dimension_numbers = #tpu.dot_dimension_numbers<[1], [0], [0], [1], [0, 0, 1, 1], [], []>} : vector<16x24xbf16>, vector<24x64xbf16>, vector<16x64xf32> -> vector<16x64xf32>
    %c1 = arith.constant 1 : index
    %c0_5 = arith.constant 0 : index
    %c0_6 = arith.constant 0 : index
    %5 = vector.load %arg5[%c1, %c0_5, %c0_6] : memref<3x16x24xbf16, #tpu.memory_space<vmem>>, vector<1x16x24xbf16>
    %6 = vector.shape_cast %5 : vector<1x16x24xbf16> to vector<16x24xbf16>
    %c0_7 = arith.constant 0 : index
    %c0_8 = arith.constant 0 : index
    %c0_9 = arith.constant 0 : index
    %7 = vector.load %arg2[%c0_7, %c0_8, %c0_9] : memref<1x24x64xbf16, #tpu.memory_space<vmem>>, vector<1x24x64xbf16>
    %8 = vector.shape_cast %7 : vector<1x24x64xbf16> to vector<24x64xbf16>
    %cst_10 = arith.constant dense<0.000000e+00> : vector<16x64xf32>
    %9 = tpu.matmul %6, %8, %cst_10 {dimension_numbers = #tpu.dot_dimension_numbers<[1], [0], [0], [1], [0, 0, 1, 1], [], []>} : vector<16x24xbf16>, vector<24x64xbf16>, vector<16x64xf32> -> vector<16x64xf32>
    %10 = arith.addf %4, %9 : vector<16x64xf32>
    %c2 = arith.constant 2 : index
    %c0_11 = arith.constant 0 : index
    %c0_12 = arith.constant 0 : index
    %11 = vector.load %arg5[%c2, %c0_11, %c0_12] : memref<3x16x24xbf16, #tpu.memory_space<vmem>>, vector<1x16x24xbf16>
    %12 = vector.shape_cast %11 : vector<1x16x24xbf16> to vector<16x24xbf16>
    %c0_13 = arith.constant 0 : index
    %c0_14 = arith.constant 0 : index
    %c0_15 = arith.constant 0 : index
    %13 = vector.load %arg3[%c0_13, %c0_14, %c0_15] : memref<1x24x64xbf16, #tpu.memory_space<vmem>>, vector<1x24x64xbf16>
    %14 = vector.shape_cast %13 : vector<1x24x64xbf16> to vector<24x64xbf16>
    %cst_16 = arith.constant dense<0.000000e+00> : vector<16x64xf32>
    %15 = tpu.matmul %12, %14, %cst_16 {dimension_numbers = #tpu.dot_dimension_numbers<[1], [0], [0], [1], [0, 0, 1, 1], [], []>} : vector<16x24xbf16>, vector<24x64xbf16>, vector<16x64xf32> -> vector<16x64xf32>
    %16 = arith.addf %10, %15 : vector<16x64xf32>
    %cst_17 = arith.constant 0.000000e+00 : f32
    %17 = vector.broadcast %cst_17 : f32 to vector<16x64xf32>
    %18 = arith.cmpf ogt, %16, %17 : vector<16x64xf32>
    %cst_18 = arith.constant 2.000000e-01 : f32
    %19 = vector.broadcast %cst_18 : f32 to vector<16x64xf32>
    %20 = arith.mulf %19, %16 : vector<16x64xf32>
    %21 = arith.select %18, %16, %20 : vector<16x64xi1>, vector<16x64xf32>
    %22 = arith.truncf %21 : vector<16x64xf32> to vector<16x64xbf16>
    %c0_19 = arith.constant 0 : index
    %c0_20 = arith.constant 0 : index
    %c0_21 = arith.constant 0 : index
    %23 = vector.load %arg6[%c0_19, %c0_20, %c0_21] : memref<1x16x64xbf16, #tpu.memory_space<vmem>>, vector<1x16x64xbf16>
    %24 = vector.shape_cast %23 : vector<1x16x64xbf16> to vector<16x64xbf16>
    %25 = vector.shape_cast %22 : vector<16x64xbf16> to vector<1x16x64xbf16>
    tpu.vector_store %arg6[%c0_19, %c0_20, %c0_21], %25 {strides = array<i32>} : memref<1x16x64xbf16, #tpu.memory_space<vmem>>, vector<1x16x64xbf16>,
    return
  }
  func.func @transform_0(%arg0: i32, %arg1: i32) -> (i32, i32, i32) {
    %c0_i32 = arith.constant 0 : i32
    %c0_i32_0 = arith.constant 0 : i32
    return %arg0, %c0_i32, %arg1 : i32, i32, i32
  }
  func.func @transform_1(%arg0: i32, %arg1: i32) -> (i32, i32, i32) {
    %c0_i32 = arith.constant 0 : i32
    %c0_i32_0 = arith.constant 0 : i32
    return %arg0, %c0_i32, %arg1 : i32, i32, i32
  }
  func.func @transform_2(%arg0: i32, %arg1: i32) -> (i32, i32, i32) {
    %c0_i32 = arith.constant 0 : i32
    %c0_i32_0 = arith.constant 0 : i32
    return %arg0, %c0_i32, %arg1 : i32, i32, i32
  }
  func.func @transform_3(%arg0: i32, %arg1: i32) -> (i32, i32, i32) {
    %c0_i32 = arith.constant 0 : i32
    %c0_i32_0 = arith.constant 0 : i32
    %c0_i32_1 = arith.constant 0 : i32
    %c0_i32_2 = arith.constant 0 : i32
    return %c0_i32, %c0_i32_0, %c0_i32_1 : i32, i32, i32
  }
  func.func @transform_4(%arg0: i32, %arg1: i32) -> (i32, i32, i32) {
    %c0_i32 = arith.constant 0 : i32
    %c0_i32_0 = arith.constant 0 : i32
    return %arg0, %c0_i32, %arg1 : i32, i32, i32
  }
}

module attributes {stable_mosaic.version = 11 : i64} {
  func.func @_conv4_tail_kernel(%arg0: memref<2x48x16xbf16, #tpu.memory_space<vmem>>, %arg1: memref<2x48x16xbf16, #tpu.memory_space<vmem>>, %arg2: memref<2x48x16xbf16, #tpu.memory_space<vmem>>, %arg3: memref<3x32x48xbf16, #tpu.memory_space<vmem>>, %arg4: memref<32x16xf32, #tpu.memory_space<vmem>>, %arg5: memref<1x1xf32, #tpu.memory_space<vmem>>, %arg6: memref<2x1xf32, #tpu.memory_space<vmem>>) attributes {dimension_semantics = [], scalar_prefetch = 0 : i64, scratch_operands = 0 : i64, tpu.core_type = #tpu.core_type<tc>} {
    %c0 = arith.constant 0 : index
    %c0_0 = arith.constant 0 : index
    %c0_1 = arith.constant 0 : index
    %0 = vector.load %arg3[%c0, %c0_0, %c0_1] : memref<3x32x48xbf16, #tpu.memory_space<vmem>>, vector<1x32x48xbf16>
    %1 = vector.shape_cast %0 : vector<1x32x48xbf16> to vector<32x48xbf16>
    %c1 = arith.constant 1 : index
    %c0_2 = arith.constant 0 : index
    %c0_3 = arith.constant 0 : index
    %2 = vector.load %arg3[%c1, %c0_2, %c0_3] : memref<3x32x48xbf16, #tpu.memory_space<vmem>>, vector<1x32x48xbf16>
    %3 = vector.shape_cast %2 : vector<1x32x48xbf16> to vector<32x48xbf16>
    %c2 = arith.constant 2 : index
    %c0_4 = arith.constant 0 : index
    %c0_5 = arith.constant 0 : index
    %4 = vector.load %arg3[%c2, %c0_4, %c0_5] : memref<3x32x48xbf16, #tpu.memory_space<vmem>>, vector<1x32x48xbf16>
    %5 = vector.shape_cast %4 : vector<1x32x48xbf16> to vector<32x48xbf16>
    %c0_6 = arith.constant 0 : index
    %c0_7 = arith.constant 0 : index
    %c0_8 = arith.constant 0 : index
    %6 = vector.load %arg2[%c0_6, %c0_7, %c0_8] : memref<2x48x16xbf16, #tpu.memory_space<vmem>>, vector<1x48x16xbf16>
    %7 = vector.shape_cast %6 : vector<1x48x16xbf16> to vector<48x16xbf16>
    %cst = arith.constant dense<0.000000e+00> : vector<32x16xf32>
    %8 = tpu.matmul %1, %7, %cst {dimension_numbers = #tpu.dot_dimension_numbers<[1], [0], [0], [1], [0, 0, 1, 1], [], []>} : vector<32x48xbf16>, vector<48x16xbf16>, vector<32x16xf32> -> vector<32x16xf32>
    %c0_9 = arith.constant 0 : index
    %c0_10 = arith.constant 0 : index
    %c0_11 = arith.constant 0 : index
    %9 = vector.load %arg0[%c0_9, %c0_10, %c0_11] : memref<2x48x16xbf16, #tpu.memory_space<vmem>>, vector<1x48x16xbf16>
    %10 = vector.shape_cast %9 : vector<1x48x16xbf16> to vector<48x16xbf16>
    %cst_12 = arith.constant dense<0.000000e+00> : vector<32x16xf32>
    %11 = tpu.matmul %3, %10, %cst_12 {dimension_numbers = #tpu.dot_dimension_numbers<[1], [0], [0], [1], [0, 0, 1, 1], [], []>} : vector<32x48xbf16>, vector<48x16xbf16>, vector<32x16xf32> -> vector<32x16xf32>
    %12 = arith.addf %8, %11 : vector<32x16xf32>
    %c0_13 = arith.constant 0 : index
    %c0_14 = arith.constant 0 : index
    %c0_15 = arith.constant 0 : index
    %13 = vector.load %arg1[%c0_13, %c0_14, %c0_15] : memref<2x48x16xbf16, #tpu.memory_space<vmem>>, vector<1x48x16xbf16>
    %14 = vector.shape_cast %13 : vector<1x48x16xbf16> to vector<48x16xbf16>
    %cst_16 = arith.constant dense<0.000000e+00> : vector<32x16xf32>
    %15 = tpu.matmul %5, %14, %cst_16 {dimension_numbers = #tpu.dot_dimension_numbers<[1], [0], [0], [1], [0, 0, 1, 1], [], []>} : vector<32x48xbf16>, vector<48x16xbf16>, vector<32x16xf32> -> vector<32x16xf32>
    %16 = arith.addf %12, %15 : vector<32x16xf32>
    %c1_17 = arith.constant 1 : index
    %c0_18 = arith.constant 0 : index
    %c0_19 = arith.constant 0 : index
    %17 = vector.load %arg2[%c1_17, %c0_18, %c0_19] : memref<2x48x16xbf16, #tpu.memory_space<vmem>>, vector<1x48x16xbf16>
    %18 = vector.shape_cast %17 : vector<1x48x16xbf16> to vector<48x16xbf16>
    %cst_20 = arith.constant dense<0.000000e+00> : vector<32x16xf32>
    %19 = tpu.matmul %1, %18, %cst_20 {dimension_numbers = #tpu.dot_dimension_numbers<[1], [0], [0], [1], [0, 0, 1, 1], [], []>} : vector<32x48xbf16>, vector<48x16xbf16>, vector<32x16xf32> -> vector<32x16xf32>
    %c1_21 = arith.constant 1 : index
    %c0_22 = arith.constant 0 : index
    %c0_23 = arith.constant 0 : index
    %20 = vector.load %arg0[%c1_21, %c0_22, %c0_23] : memref<2x48x16xbf16, #tpu.memory_space<vmem>>, vector<1x48x16xbf16>
    %21 = vector.shape_cast %20 : vector<1x48x16xbf16> to vector<48x16xbf16>
    %cst_24 = arith.constant dense<0.000000e+00> : vector<32x16xf32>
    %22 = tpu.matmul %3, %21, %cst_24 {dimension_numbers = #tpu.dot_dimension_numbers<[1], [0], [0], [1], [0, 0, 1, 1], [], []>} : vector<32x48xbf16>, vector<48x16xbf16>, vector<32x16xf32> -> vector<32x16xf32>
    %23 = arith.addf %19, %22 : vector<32x16xf32>
    %c1_25 = arith.constant 1 : index
    %c0_26 = arith.constant 0 : index
    %c0_27 = arith.constant 0 : index
    %24 = vector.load %arg1[%c1_25, %c0_26, %c0_27] : memref<2x48x16xbf16, #tpu.memory_space<vmem>>, vector<1x48x16xbf16>
    %25 = vector.shape_cast %24 : vector<1x48x16xbf16> to vector<48x16xbf16>
    %cst_28 = arith.constant dense<0.000000e+00> : vector<32x16xf32>
    %26 = tpu.matmul %5, %25, %cst_28 {dimension_numbers = #tpu.dot_dimension_numbers<[1], [0], [0], [1], [0, 0, 1, 1], [], []>} : vector<32x48xbf16>, vector<48x16xbf16>, vector<32x16xf32> -> vector<32x16xf32>
    %27 = arith.addf %23, %26 : vector<32x16xf32>
    %cst_29 = arith.constant 0.000000e+00 : f32
    %28 = vector.broadcast %cst_29 : f32 to vector<32x16xf32>
    %29 = arith.addf %28, %16 : vector<32x16xf32>
    %30 = arith.addf %29, %27 : vector<32x16xf32>
    %cst_30 = arith.constant 2.000000e+00 : f32
    %31 = vector.broadcast %cst_30 : f32 to vector<32x16xf32>
    %32 = arith.divf %30, %31 : vector<32x16xf32>
    %33 = arith.subf %16, %32 : vector<32x16xf32>
    %34 = arith.mulf %33, %33 : vector<32x16xf32>
    %cst_31 = arith.constant 0.000000e+00 : f32
    %35 = vector.broadcast %cst_31 : f32 to vector<32x16xf32>
    %36 = arith.addf %35, %34 : vector<32x16xf32>
    %37 = arith.subf %27, %32 : vector<32x16xf32>
    %38 = arith.mulf %37, %37 : vector<32x16xf32>
    %39 = arith.addf %36, %38 : vector<32x16xf32>
    %cst_32 = arith.constant 2.000000e+00 : f32
    %40 = vector.broadcast %cst_32 : f32 to vector<32x16xf32>
    %41 = arith.divf %39, %40 : vector<32x16xf32>
    %cst_33 = arith.constant 9.99999993E-9 : f32
    %42 = vector.broadcast %cst_33 : f32 to vector<32x16xf32>
    %43 = arith.addf %41, %42 : vector<32x16xf32>
    %44 = math.sqrt %43 : vector<32x16xf32>
    %45 = vector.shape_cast %44 : vector<32x16xf32> to vector<1x32x16xf32>
    %cst_34 = arith.constant dense<0.000000e+00> : vector<1xf32>
    %46 = vector.multi_reduction <add>, %45, %cst_34 [1, 2] : vector<1x32x16xf32> to vector<1xf32>
    %47 = vector.shape_cast %46 : vector<1xf32> to vector<1x1x1xf32>
    %48 = vector.extract %47[0, 0, 0] : f32 from vector<1x1x1xf32>
    %49 = vector.broadcast %48 : f32 to vector<1x1xf32>
    %cst_35 = arith.constant 5.120000e+02 : f32
    %50 = vector.broadcast %cst_35 : f32 to vector<1x1xf32>
    %51 = arith.divf %49, %50 : vector<1x1xf32>
    %c0_36 = arith.constant 0 : index
    %c0_37 = arith.constant 0 : index
    %52 = vector.load %arg4[%c0_36, %c0_37] : memref<32x16xf32, #tpu.memory_space<vmem>>, vector<32x16xf32>
    %c0_38 = arith.constant 0 : index
    %c0_39 = arith.constant 0 : index
    %53 = vector.load %arg5[%c0_38, %c0_39] : memref<1x1xf32, #tpu.memory_space<vmem>>, vector<1x1xf32>
    %54 = tpu.iota {dimensions = array<i32: 0>} : vector<2x1xi32>
    %cst_40 = arith.constant 0.000000e+00 : f32
    %55 = vector.broadcast %cst_40 : f32 to vector<2x1xf32>
    %cst_41 = arith.constant 0.000000e+00 : f32
    %56 = vector.broadcast %cst_41 : f32 to vector<32x16xf32>
    %57 = arith.cmpf ogt, %16, %56 : vector<32x16xf32>
    %cst_42 = arith.constant 2.000000e-01 : f32
    %58 = vector.broadcast %cst_42 : f32 to vector<32x16xf32>
    %59 = arith.mulf %58, %16 : vector<32x16xf32>
    %60 = arith.select %57, %16, %59 : vector<32x16xi1>, vector<32x16xf32>
    %61 = arith.mulf %60, %52 : vector<32x16xf32>
    %62 = vector.shape_cast %61 : vector<32x16xf32> to vector<1x32x16xf32>
    %cst_43 = arith.constant dense<0.000000e+00> : vector<1xf32>
    %63 = vector.multi_reduction <add>, %62, %cst_43 [1, 2] : vector<1x32x16xf32> to vector<1xf32>
    %64 = vector.shape_cast %63 : vector<1xf32> to vector<1x1x1xf32>
    %65 = vector.extract %64[0, 0, 0] : f32 from vector<1x1x1xf32>
    %66 = vector.broadcast %65 : f32 to vector<1x1xf32>
    %c0_i32 = arith.constant 0 : i32
    %67 = vector.broadcast %c0_i32 : i32 to vector<2x1xi32>
    %68 = arith.cmpi eq, %54, %67 : vector<2x1xi32>
    %69 = vector.shape_cast %66 : vector<1x1xf32> to vector<1x1xf32>
    %70 = vector.broadcast %69 : vector<1x1xf32> to vector<2x1xf32>
    %71 = arith.select %68, %70, %55 : vector<2x1xi1>, vector<2x1xf32>
    %cst_44 = arith.constant 0.000000e+00 : f32
    %72 = vector.broadcast %cst_44 : f32 to vector<32x16xf32>
    %73 = arith.cmpf ogt, %27, %72 : vector<32x16xf32>
    %cst_45 = arith.constant 2.000000e-01 : f32
    %74 = vector.broadcast %cst_45 : f32 to vector<32x16xf32>
    %75 = arith.mulf %74, %27 : vector<32x16xf32>
    %76 = arith.select %73, %27, %75 : vector<32x16xi1>, vector<32x16xf32>
    %77 = arith.mulf %76, %52 : vector<32x16xf32>
    %78 = vector.shape_cast %77 : vector<32x16xf32> to vector<1x32x16xf32>
    %cst_46 = arith.constant dense<0.000000e+00> : vector<1xf32>
    %79 = vector.multi_reduction <add>, %78, %cst_46 [1, 2] : vector<1x32x16xf32> to vector<1xf32>
    %80 = vector.shape_cast %79 : vector<1xf32> to vector<1x1x1xf32>
    %81 = vector.extract %80[0, 0, 0] : f32 from vector<1x1x1xf32>
    %82 = vector.broadcast %81 : f32 to vector<1x1xf32>
    %c1_i32 = arith.constant 1 : i32
    %83 = vector.broadcast %c1_i32 : i32 to vector<2x1xi32>
    %84 = arith.cmpi eq, %54, %83 : vector<2x1xi32>
    %85 = vector.shape_cast %82 : vector<1x1xf32> to vector<1x1xf32>
    %86 = vector.broadcast %85 : vector<1x1xf32> to vector<2x1xf32>
    %87 = arith.select %84, %86, %71 : vector<2x1xi1>, vector<2x1xf32>
    %88 = arith.mulf %51, %53 : vector<1x1xf32>
    %89 = vector.broadcast %88 : vector<1x1xf32> to vector<2x1xf32>
    %90 = arith.addf %87, %89 : vector<2x1xf32>
    %cst_47 = arith.constant 0.000000e+00 : f32
    %91 = vector.broadcast %cst_47 : f32 to vector<2x1xf32>
    %92 = arith.subf %91, %90 : vector<2x1xf32>
    %93 = math.exp %92 : vector<2x1xf32>
    %cst_48 = arith.constant 1.000000e+00 : f32
    %94 = vector.broadcast %cst_48 : f32 to vector<2x1xf32>
    %95 = arith.addf %94, %93 : vector<2x1xf32>
    %cst_49 = arith.constant 1.000000e+00 : f32
    %96 = vector.broadcast %cst_49 : f32 to vector<2x1xf32>
    %97 = arith.divf %96, %95 : vector<2x1xf32>
    %c0_50 = arith.constant 0 : index
    %c0_51 = arith.constant 0 : index
    %98 = vector.load %arg6[%c0_50, %c0_51] : memref<2x1xf32, #tpu.memory_space<vmem>>, vector<2x1xf32>
    tpu.vector_store %arg6[%c0_50, %c0_51], %97 {strides = array<i32>} : memref<2x1xf32, #tpu.memory_space<vmem>>, vector<2x1xf32>,
    return
  }
}

</mosaic_0001>

<bundles_post_ra>
// kernel: discriminator_forward.4
= control target key start
LH: loop header
LB: loop body
LE: loop exit
PB: predicated region body
PF: predicated region fallthrough
CT: control target
= control target key end

     0   :  { %s1118_s15 = smov 0   ;;  %s1120_s16 = smov 0   ;;  %s1250_s0 = inlined_call_operand.vmem [shape: bf16[2,9,1024], index: 0, kind: input, shape index: {}]   ;;  %s1251_s1 = inlined_call_operand.vmem [shape: bf16[2,9,1024], index: 1, kind: input, shape index: {}]   ;;  %s1252_s2 = inlined_call_operand.vmem [shape: bf16[2,9,1024], index: 2, kind: input, shape index: {}]   ;;  %s1253_s3 = inlined_call_operand.vmem [shape: bf16[3,4,9], index: 3, kind: input, shape index: {}]   ;;  %s1254_s4 = inlined_call_operand.vmem [shape: bf16[2,4,1024], index: 4, kind: output, shape index: {}]  }
   0x1   :  { %s1122_s17 = smov 0   ;;  %s1124_s18 = smov 0  }
   0x2   :  { %s1126_s19 = smov 0   ;;  %s1128_s20 = smov 0  }
   0x3   :  { %s1130_s21 = smov 0  }
   0x4 LB: > { %s23_s22 = sadd.s32 1, %s1080_s19  ;;  %s26_s23 = sadd.s32 1, %s1084_s20  ;;  %s1088_s21 = sphi %s1130_s21, %s14_s21   ;;  %s1084_s20 = sphi %s1128_s20, %s1261_s20   ;;  %s1080_s19 = sphi %s1126_s19, %s1260_s19   ;;  %s1076_s18 = sphi %s1124_s18, %s1259_s18   ;;  %s1072_s17 = sphi %s1122_s17, %s1258_s17   ;;  %s1068_s16 = sphi %s1120_s16, %s1257_s16   ;;  %s1064_s15 = sphi %s1118_s15, %s1256_s15  }
   0x5   : > { %p24_p0 = scmp.ge.s32.totalorder %s23_s22, 2  ;;  %p42_p1 = scmp.ne.s32.totalorder %s1068_s16, %s1064_s15 }
   0x6   : > { %p43_p2 = scmp.eq.s32.totalorder %s1088_s21, 0  ;;  %s35_s28 = sadd.s32 1, %s1068_s16 }
   0x7   : > { %s1263_s22 = smov (%p24_p0, %s23_s22), 0  ;;  %s1265_s23 = smov (!%p24_p0, %s26_s23), %s1084_s20 }
   0x8   : > { %p1161_p3 = por %p43_p2, %p42_p1  ;;  %p28_p4 = scmp.ge.s32.totalorder %s1265_s23, 2 }
   0x9   : > { %s31_s25 = ssub.s32 %s1080_s19, %s1263_s22  ;;  %p897_p6 = scmp.ge.s32.totalorder %s1088_s21, 4 }
   0xa   : > { %s1267_s23 = smov (%p28_p4, %s1265_s23), 0 }
   0xb   : > { %s30_s26 = ssub.s32 %s1084_s20, %s1267_s23  ;;  %176 = sbr.rel (%p897_p6) target bundleno = 45 (0x2d), region = 20 }
   0xc   : > { %s32_s27 = sor.u32 %s31_s25, %s30_s26 }
   0xd   : > { %p33_p5 = scmp.eq.s32.totalorder %s32_s27, 0 }
   0xf   : > { %s1173_s29 = scalar_select %p33_p5, %s1068_s16, %s35_s28  }
  0x12   : > { %179 = sbr.rel (!%p1161_p3) target bundleno = 27 (0x1b), region = 24  ;;  %s181_s30 = sand.u32 (%p1161_p3), 1, %s1068_s16  }
  0x13   : > { %s899_s5 = sshll.u32 (%p1161_p3), %s1080_s19, 2  ;;  %s898_s6 = sshll.u32 (%p1161_p3), %s181_s30, 5 }
  0x14   : > { %s900_s7 = sshll.u32 (%p1161_p3), %s1084_s20, 4  ;;  %s183_s13 = scalar_lea.vmem (%p1161_p3), [#allocation2], %s898_s6 }
  0x15   : > { %s186_s8 = sadd.s32 (%p1161_p3), %s900_s7, %s899_s5 }
  0x16   : > { %s901_s9 = sshll.u32 (%p1161_p3), %s186_s8, 2 }
  0x17   : > { %s188_s12 = scalar_lea.vmem (%p1161_p3), %s1250_s0, %s901_s9 }
  0x18   : > { %v201_v0 = vld [vmem:[%s188_s12] sm:$0xff] (%p1161_p3)  ;;  %v203_v1 = vld [vmem:[%s188_s12 + $0x8] sm:$0xff] (%p1161_p3) }
  0x19   : > { %v205_v2 = vld [vmem:[%s188_s12 + $0x20] sm:$0xff]  ;;  %202 = vst [vmem:[%s183_s13] sm:$0xff] %v201_v0  ;;  %204 = vst [vmem:[%s183_s13 + $0x8] sm:$0xff] %v203_v1  ;;  %v207_v3 = vld [vmem:[%s188_s12 + $0x28] sm:$0xff] }
  0x1a   : > { %206 = vst [vmem:[%s183_s13 + $0x10] sm:$0xff] %v205_v2  ;;  %208 = vst [vmem:[%s183_s13 + $0x18] sm:$0xff] %v207_v3 }
  0x1b PF: > { %214 = sbr.rel (!%p1161_p3) target bundleno = 36 (0x24), region = 47  ;;  %s216_s14 = sand.u32 (%p1161_p3), 1, %s1068_s16  }
  0x1c   : > { %s903_s25 = sshll.u32 (%p1161_p3), %s1080_s19, 2  ;;  %s902_s26 = sshll.u32 (%p1161_p3), %s216_s14, 5 }
  0x1d   : > { %s904_s27 = sshll.u32 (%p1161_p3), %s1084_s20, 4  ;;  %s218_s8 = scalar_lea.vmem (%p1161_p3), [#allocation3], %s902_s26 }
  0x1e   : > { %s221_s28 = sadd.s32 (%p1161_p3), %s904_s27, %s903_s25 }
  0x1f   : > { %s905_s30 = sshll.u32 (%p1161_p3), %s221_s28, 2 }
  0x20   : > { %s223_s7 = scalar_lea.vmem (%p1161_p3), %s1251_s1, %s905_s30 }
  0x21   : > { %v236_v4 = vld [vmem:[%s223_s7] sm:$0xff] (%p1161_p3)  ;;  %v238_v5 = vld [vmem:[%s223_s7 + $0x8] sm:$0xff] (%p1161_p3) }
  0x22   : > { %v240_v6 = vld [vmem:[%s223_s7 + $0x20] sm:$0xff]  ;;  %237 = vst [vmem:[%s218_s8] sm:$0xff] %v236_v4  ;;  %239 = vst [vmem:[%s218_s8 + $0x8] sm:$0xff] %v238_v5  ;;  %v242_v7 = vld [vmem:[%s223_s7 + $0x28] sm:$0xff] }
  0x23   : > { %241 = vst [vmem:[%s218_s8 + $0x10] sm:$0xff] %v240_v6  ;;  %243 = vst [vmem:[%s218_s8 + $0x18] sm:$0xff] %v242_v7 }
  0x24 PF: > { %249 = sbr.rel (!%p1161_p3) target bundleno = 45 (0x2d), region = 70  ;;  %s251_s9 = sand.u32 (%p1161_p3), 1, %s1068_s16  }
  0x25   : > { %s907_s10 = sshll.u32 (%p1161_p3), %s1080_s19, 2  ;;  %s906_s11 = sshll.u32 (%p1161_p3), %s251_s9, 5 }
  0x26   : > { %s908_s12 = sshll.u32 (%p1161_p3), %s1084_s20, 4  ;;  %s253_s28 = scalar_lea.vmem (%p1161_p3), [#allocation4], %s906_s11 }
  0x27   : > { %s256_s13 = sadd.s32 (%p1161_p3), %s908_s12, %s907_s10 }
  0x28   : > { %s909_s14 = sshll.u32 (%p1161_p3), %s256_s13, 2 }
  0x29   : > { %s258_s27 = scalar_lea.vmem (%p1161_p3), %s1252_s2, %s909_s14 }
  0x2a   : > { %v271_v8 = vld [vmem:[%s258_s27] sm:$0xff] (%p1161_p3)  ;;  %v273_v9 = vld [vmem:[%s258_s27 + $0x8] sm:$0xff] (%p1161_p3) }
  0x2b   : > { %v275_v10 = vld [vmem:[%s258_s27 + $0x20] sm:$0xff]  ;;  %272 = vst [vmem:[%s253_s28] sm:$0xff] %v271_v8  ;;  %274 = vst [vmem:[%s253_s28 + $0x8] sm:$0xff] %v273_v9  ;;  %v277_v11 = vld [vmem:[%s258_s27 + $0x28] sm:$0xff] }
  0x2c   : > { %276 = vst [vmem:[%s253_s28 + $0x10] sm:$0xff] %v275_v10  ;;  %278 = vst [vmem:[%s253_s28 + $0x18] sm:$0xff] %v277_v11 }
  0x2d PF: > { %p910_p7 = scmp.ge.s32.totalorder %s1088_s21, 1  ;;  %p283_p8 = scmp.lt.s32.totalorder %s1088_s21, 5 }
  0x2f   : > { %p284_p9 = pnand %p910_p7, %p283_p8 }
  0x30   : > { %s290_s24 = sand.u32 (!%p284_p9), 1, %s1064_s15   ;;  %vm386_vm0 = vcmask (!%p284_p9), 1043456   ;;  %vm387_vm1 = vcmask (!%p284_p9), 1044480   ;;  %v1090_v12 = vmov (!%p284_p9), 65535   ;;  %v1091_v14 = vmov (!%p284_p9), 0   ;;  %s914_s13 = sshll.u32 (!%p284_p9), %s1072_s17, 2 }
  0x31   : > { %287 = sbr.rel (%p284_p9) target bundleno = 307 (0x133), region = 93  ;;  %s1203_s30 = sshll.u32 (!%p284_p9), %s290_s24, 5  ;;  %v388_v13 = vsel (!%p284_p9), %vm386_vm0, 4294967295, %v1090_v12  ;;  %434 = vmatprep.mubr.bf16.mxu0 (!%p284_p9), %v1091_v14  ;;  %475 = vmatprep.mubr.bf16.mxu1 (!%p284_p9), %v1091_v14  ;;  %v917_v28 = vld [vmem:[%s1253_s3 + $0x2] sm:$0x3] (!%p284_p9)  ;;  %vm382_vm2 = vcmask (!%p284_p9), 72704   ;;  %v745_v45 = vlaneseq (!%p284_p9) }
  0x32   : > { %v389_v15 = vsel (!%p284_p9), %vm387_vm1, %v388_v13, 0  ;;  %s292_s5 = scalar_lea.vmem (!%p284_p9), [#allocation2], %s1203_s30  ;;  %s306_s15 = scalar_lea.vmem (!%p284_p9), [#allocation4], %s1203_s30  ;;  %v355_v39 = vld [vmem:[%s1253_s3] sm:$0x3] (!%p284_p9) }
  0x33   : > { %v1016_v16 = vld [vmem:[%s292_s5 + $0x4] ss:$16 sps:$4 sm:$0x1f] (!%p284_p9)   ;;  %v1018_v17 = vld [vmem:[%s292_s5 + $0xc] ss:$16 sps:$4 sm:$0x1f] (!%p284_p9)  }
  0x34   : > { %v394_v18 = vand.u32 (!%p284_p9), %v1016_v16, %v389_v15  ;;  %v1020_v19 = vld [vmem:[%s292_s5] ss:$16 sps:$4 sm:$0x1f] (!%p284_p9)   ;;  %v1021_v20 = vld [vmem:[%s292_s5 + $0x8] ss:$16 sps:$4 sm:$0x1f] (!%p284_p9)   ;;  %v400_v21 = vand.u32 (!%p284_p9), %v1018_v17, %v389_v15 }
  0x35   : > { %v1022_v22 = vld [vmem:[%s306_s15] ss:$16 sps:$4 sm:$0x1f] (!%p284_p9)   ;;  %v391_v23 = vand.u32 (!%p284_p9), %v1020_v19, %v389_v15  ;;  %v397_v24 = vand.u32 (!%p284_p9), %v1021_v20, %v389_v15  ;;  %v1024_v25 = vld [vmem:[%s306_s15 + $0x4] ss:$16 sps:$4 sm:$0x1f] (!%p284_p9)  }
  0x36   : > { %402 = vmatprep.subr.bf16.mxu0 (!%p284_p9), %v394_v18  ;;  %443 = vmatprep.subr.bf16.mxu1 (!%p284_p9), %v400_v21  ;;  %v1025_v26 = vld [vmem:[%s306_s15 + $0x8] ss:$16 sps:$4 sm:$0x1f] (!%p284_p9)   ;;  %v1027_v27 = vld [vmem:[%s306_s15 + $0xc] ss:$16 sps:$4 sm:$0x1f] (!%p284_p9)   ;;  %v507_v29 = vand.u32 (!%p284_p9), %v1024_v25, %v389_v15  ;;  %v504_v30 = vand.u32 (!%p284_p9), %v1022_v22, %v389_v15 }
  0x37   : > { %403 = vmatpush1.bf16.msra.mxu0 (!%p284_p9), %v391_v23  ;;  %444 = vmatpush1.bf16.msra.mxu1 (!%p284_p9), %v397_v24  ;;  %v513_v31 = vand.u32 (!%p284_p9), %v1027_v27, %v389_v15  ;;  %v510_v32 = vand.u32 (!%p284_p9), %v1025_v26, %v389_v15  ;;  %s299_s8 = scalar_lea.vmem (!%p284_p9), [#allocation3], %s1203_s30  ;;  %v930_v42 = vld [vmem:[%s1253_s3 + $0x4] sm:$0x3] (!%p284_p9)  ;;  %p345_p10 = scmp.lt.s32.totalorder (!%p284_p9), %s1076_s18, 1  ;;  %v1092_v43 = vmov (!%p284_p9), 1983009808  }
  0x38   : > { %515 = vmatprep.subr.bf16.mxu0 %v507_v29  ;;  %v1030_v33 = vld [vmem:[%s299_s8 + $0x4] ss:$16 sps:$4 sm:$0x1f]   ;;  %v1033_v34 = vld [vmem:[%s299_s8 + $0xc] ss:$16 sps:$4 sm:$0x1f]   ;;  %v743_v44 = vunpack.c.l.s4 %v1092_v43 }
  0x39   : > { %556 = vmatprep.subr.bf16.mxu1 %v513_v31  ;;  %v626_v35 = vand.u32 %v1030_v33, %v389_v15  ;;  %v632_v36 = vand.u32 %v1033_v34, %v389_v15  ;;  %v1028_v37 = vld [vmem:[%s299_s8] ss:$16 sps:$4 sm:$0x1f]   ;;  %v1031_v38 = vld [vmem:[%s299_s8 + $0x8] ss:$16 sps:$4 sm:$0x1f]  }
  0x3a   : > { %922 = vmatmul.mubr.msk.bf16.vlgmr.msra.gmra.mrb[0].mxu0 %vm382_vm2, %v917_v28  ;;  %923 = vmatmul.mubr.msk.bf16.vlgmr.msra.gmra.mrb[0].mxu1 %vm382_vm2, %v917_v28  ;;  %v623_v40 = vand.u32 %v1028_v37, %v389_v15  ;;  %v629_v41 = vand.u32 %v1031_v38, %v389_v15  ;;  %p347_p11 = scmp.lt.s32.totalorder %s914_s13, 7  ;;  %s1269_s18 = smov (!%p345_p10, %s1076_s18), 1  ;;  %v744_v48 = vunpack.c.0.s8 %v743_v44  ;;  %v746_v49 = vshrl.u32 %v745_v45, 7 }
  0x3b   : > { %516 = vmatpush1.bf16.msra.mxu0 %v504_v30  ;;  %557 = vmatpush1.bf16.msra.mxu1 %v510_v32  ;;  %s915_s14 = sshll.u32 %s1269_s18, 3 }
  0x3c   : > { %547 = vmatprep.mubr.bf16.mxu0 %v1091_v14  ;;  %588 = vmatprep.mubr.bf16.mxu1 %v1091_v14  ;;  %s1271_s13 = smov (!%p347_p11, %s914_s13), 7  ;;  %v747_v59 = vsub.s32 %v744_v48, %v746_v49 }
  0x3d   : > { %634 = vmatprep.subr.bf16.mxu0 %v626_v35  ;;  %675 = vmatprep.subr.bf16.mxu1 %v632_v36  ;;  %s350_s17 = sadd.s32 %s915_s14, %s1271_s13 }
  0x3e   : > { %s916_s18 = sshll.u32 %s350_s17, 1 }
  0x3f   : > { %s352_s27 = scalar_lea.vmem %s1254_s4, %s916_s18 }
  0x46   : > { %928 = vmatmul.mubr.msk.bf16.vlgmr.msra.gmra.mrb[0].mxu0 %vm382_vm2, %v355_v39  ;;  %929 = vmatmul.mubr.msk.bf16.vlgmr.msra.gmra.mrb[0].mxu1 %vm382_vm2, %v355_v39 }
  0x47   : > { %635 = vmatpush1.bf16.msra.mxu0 %v623_v40  ;;  %676 = vmatpush1.bf16.msra.mxu1 %v629_v41 }
  0x48   : > { %666 = vmatprep.mubr.bf16.mxu0 %v1091_v14  ;;  %707 = vmatprep.mubr.bf16.mxu1 %v1091_v14 }
  0x52   : > { %935 = vmatmul.mubr.msk.bf16.vlgmr.msra.gmra.mrb[0].mxu0 %vm382_vm2, %v930_v42  ;;  %936 = vmatmul.mubr.msk.bf16.vlgmr.msra.gmra.mrb[0].mxu1 %vm382_vm2, %v930_v42 }
 0x125   : > { %v668_v46 = vpop.f32.mrb[0].mxu0  ;;  %v709_v47 = vpop.f32.mrb[0].mxu1 }
 0x126   : > { %vm720_vm3 = vcmp.gt.f32.partialorder %v668_v46, 0.0  ;;  %v724_v50 = vmul.f32 0.2, %v668_v46  ;;  %vm722_vm4 = vcmp.gt.f32.partialorder %v709_v47, 0.0  ;;  %v726_v51 = vmul.f32 0.2, %v709_v47 }
 0x127   : > { %v670_v52 = vpop.f32.mrb[1].mxu0  ;;  %v711_v53 = vpop.f32.mrb[1].mxu1 }
 0x128   : > { %v728_v54 = vsel %vm720_vm3, %v668_v46, %v724_v50  ;;  %vm721_vm5 = vcmp.gt.f32.partialorder %v670_v52, 0.0  ;;  %v725_v55 = vmul.f32 0.2, %v670_v52  ;;  %v672_v56 = vpop.f32.mrb[2].mxu0  ;;  %v713_v57 = vpop.f32.mrb[2].mxu1  ;;  %v730_v58 = vsel %vm722_vm4, %v709_v47, %v726_v51 }
 0x129   : > { %vm723_vm6 = vcmp.gt.f32.partialorder %v711_v53, 0.0  ;;  %v727_v60 = vmul.f32 0.2, %v711_v53  ;;  %v673_v61 = vpop.f32.mrb[3].mxu0  ;;  %v714_v62 = vpop.f32.mrb[3].mxu1 }
 0x12a   : > { %v729_v63 = vsel %vm721_vm5, %v670_v52, %v725_v55 }
 0x12b   : > { %v937_v0 = vpack.c.bf16 %v729_v63, %v728_v54  ;;  %v731_v1 = vsel %vm723_vm6, %v711_v53, %v727_v60 }
 0x12c   : > { %v938_v2 = vpack.c.bf16 %v731_v1, %v730_v58 }
 0x12d   : > { %v748_v3 = vrot.slane %v937_v0, %v747_v59 }
 0x12e   : > { %v755_v4 = vrot.slane %v938_v2, %v747_v59 }
 0x130   : > { %v756_v5 = vcombine.low %v748_v3, %v755_v4 }
 0x132   : > { %758 = vst [vmem:[%s352_s27] sm:$0xff] %v756_v5 }
 0x133 PF: > { %s14_s21 = sadd.s32 1, %s1088_s21   ;;  %s1256_s15 = smov %s1068_s16 }
 0x134   : > { %p11_p12 = scmp.ge.s32.totalorder %s14_s21, 6   ;;  %s1257_s16 = smov %s1173_s29 }
 0x135   : > { %s1258_s17 = smov %s1080_s19  ;;  %s1259_s18 = smov %s1084_s20 }
 0x136   : > { %s1260_s19 = smov %s1263_s22  ;;  %s1261_s20 = smov %s1267_s23 }
 0x137   :  { %13 = sbr.rel (!%p11_p12) target bundleno = 4 (0x4), region = 158 }

// kernel: discriminator_forward.5
= control target key start
LH: loop header
LB: loop body
LE: loop exit
PB: predicated region body
PF: predicated region fallthrough
CT: control target
= control target key end

     0   :  { %s908_s15 = smov 0   ;;  %s910_s16 = smov 0   ;;  %s1036_s0 = inlined_call_operand.vmem [shape: bf16[2,12,256], index: 0, kind: input, shape index: {}]   ;;  %s1037_s1 = inlined_call_operand.vmem [shape: bf16[2,12,256], index: 1, kind: input, shape index: {}]   ;;  %s1038_s2 = inlined_call_operand.vmem [shape: bf16[2,12,256], index: 2, kind: input, shape index: {}]   ;;  %s1039_s3 = inlined_call_operand.vmem [shape: bf16[3,8,12], index: 3, kind: input, shape index: {}]   ;;  %s1040_s4 = inlined_call_operand.vmem [shape: bf16[2,8,256], index: 4, kind: output, shape index: {}]  }
   0x1   :  { %s912_s17 = smov 0   ;;  %s914_s18 = smov 0  }
   0x2   :  { %s916_s19 = smov 0   ;;  %s918_s20 = smov 0  }
   0x3   :  { %s920_s21 = smov 0  }
   0x4 LB: > { %s23_s22 = sadd.s32 1, %s871_s19  ;;  %s26_s23 = sadd.s32 1, %s875_s20  ;;  %s879_s21 = sphi %s920_s21, %s14_s21   ;;  %s875_s20 = sphi %s918_s20, %s1047_s20   ;;  %s871_s19 = sphi %s916_s19, %s1046_s19   ;;  %s867_s18 = sphi %s914_s18, %s1045_s18   ;;  %s863_s17 = sphi %s912_s17, %s1044_s17   ;;  %s859_s16 = sphi %s910_s16, %s1043_s16   ;;  %s855_s15 = sphi %s908_s15, %s1042_s15  }
   0x5   : > { %p24_p0 = scmp.ge.s32.totalorder %s23_s22, 2  ;;  %p42_p1 = scmp.ne.s32.totalorder %s859_s16, %s855_s15 }
   0x6   : > { %p43_p2 = scmp.eq.s32.totalorder %s879_s21, 0  ;;  %s35_s28 = sadd.s32 1, %s859_s16 }
   0x7   : > { %s1049_s22 = smov (%p24_p0, %s23_s22), 0  ;;  %s1051_s23 = smov (!%p24_p0, %s26_s23), %s875_s20 }
   0x8   : > { %p951_p3 = por %p43_p2, %p42_p1  ;;  %p28_p4 = scmp.ge.s32.totalorder %s1051_s23, 2 }
   0x9   : > { %s31_s25 = ssub.s32 %s871_s19, %s1049_s22  ;;  %p709_p6 = scmp.ge.s32.totalorder %s879_s21, 4 }
   0xa   : > { %s1053_s23 = smov (%p28_p4, %s1051_s23), 0 }
   0xb   : > { %s30_s26 = ssub.s32 %s875_s20, %s1053_s23  ;;  %176 = sbr.rel (%p709_p6) target bundleno = 39 (0x27), region = 20 }
   0xc   : > { %s32_s27 = sor.u32 %s31_s25, %s30_s26 }
   0xd   : > { %p33_p5 = scmp.eq.s32.totalorder %s32_s27, 0 }
   0xf   : > { %s963_s29 = scalar_select %p33_p5, %s859_s16, %s35_s28  }
  0x12   : > { %179 = sbr.rel (!%p951_p3) target bundleno = 25 (0x19), region = 24  ;;  %s181_s30 = sand.u32 (%p951_p3), 1, %s859_s16  }
  0x13   : > { %s711_s5 = sshll.u32 (%p951_p3), %s875_s20, 2  ;;  %s710_s6 = sshll.u32 (%p951_p3), %s181_s30, 3 }
  0x14   : > { %s185_s7 = sadd.s32 (%p951_p3), %s871_s19, %s711_s5  ;;  %s183_s12 = scalar_lea.vmem (%p951_p3), [#allocation2], %s710_s6 }
  0x15   : > { %s712_s8 = sshll.u32 (%p951_p3), %s185_s7, 2 }
  0x16   : > { %s187_s11 = scalar_lea.vmem (%p951_p3), %s1036_s0, %s712_s8 }
  0x17   : > { %v203_v0 = vld [vmem:[%s187_s11] sm:$0xf] (%p951_p3)  ;;  %v205_v1 = vld [vmem:[%s187_s11 + $0x8] sm:$0xf] (%p951_p3) }
  0x18   : > { %204 = vst [vmem:[%s183_s12] sm:$0xf] (%p951_p3), %v203_v0  ;;  %206 = vst [vmem:[%s183_s12 + $0x4] sm:$0xf] (%p951_p3), %v205_v1 }
  0x19 PF: > { %233 = sbr.rel (!%p951_p3) target bundleno = 32 (0x20), region = 65  ;;  %s235_s13 = sand.u32 (%p951_p3), 1, %s859_s16  }
  0x1a   : > { %s714_s14 = sshll.u32 (%p951_p3), %s875_s20, 2  ;;  %s713_s25 = sshll.u32 (%p951_p3), %s235_s13, 3 }
  0x1b   : > { %s239_s26 = sadd.s32 (%p951_p3), %s871_s19, %s714_s14  ;;  %s237_s6 = scalar_lea.vmem (%p951_p3), [#allocation3], %s713_s25 }
  0x1c   : > { %s715_s27 = sshll.u32 (%p951_p3), %s239_s26, 2 }
  0x1d   : > { %s241_s5 = scalar_lea.vmem (%p951_p3), %s1037_s1, %s715_s27 }
  0x1e   : > { %v257_v2 = vld [vmem:[%s241_s5] sm:$0xf] (%p951_p3)  ;;  %v259_v3 = vld [vmem:[%s241_s5 + $0x8] sm:$0xf] (%p951_p3) }
  0x1f   : > { %258 = vst [vmem:[%s237_s6] sm:$0xf] (%p951_p3), %v257_v2  ;;  %260 = vst [vmem:[%s237_s6 + $0x4] sm:$0xf] (%p951_p3), %v259_v3 }
  0x20 PF: > { %287 = sbr.rel (!%p951_p3) target bundleno = 39 (0x27), region = 106  ;;  %s289_s7 = sand.u32 (%p951_p3), 1, %s859_s16  }
  0x21   : > { %s717_s8 = sshll.u32 (%p951_p3), %s875_s20, 2  ;;  %s716_s9 = sshll.u32 (%p951_p3), %s289_s7, 3 }
  0x22   : > { %s293_s10 = sadd.s32 (%p951_p3), %s871_s19, %s717_s8  ;;  %s291_s25 = scalar_lea.vmem (%p951_p3), [#allocation4], %s716_s9 }
  0x23   : > { %s718_s11 = sshll.u32 (%p951_p3), %s293_s10, 2 }
  0x24   : > { %s295_s14 = scalar_lea.vmem (%p951_p3), %s1038_s2, %s718_s11 }
  0x25   : > { %v311_v4 = vld [vmem:[%s295_s14] sm:$0xf] (%p951_p3)  ;;  %v313_v5 = vld [vmem:[%s295_s14 + $0x8] sm:$0xf] (%p951_p3) }
  0x26   : > { %312 = vst [vmem:[%s291_s25] sm:$0xf] (%p951_p3), %v311_v4  ;;  %314 = vst [vmem:[%s291_s25 + $0x4] sm:$0xf] (%p951_p3), %v313_v5 }
  0x27 PF: > { %p719_p7 = scmp.ge.s32.totalorder %s879_s21, 1  ;;  %p340_p8 = scmp.lt.s32.totalorder %s879_s21, 5 }
  0x29   : > { %p341_p9 = pnand %p719_p7, %p340_p8 }
  0x2a   : > { %s347_s24 = sand.u32 (!%p341_p9), 1, %s855_s15   ;;  %v881_v6 = vmov (!%p341_p9), 0.0   ;;  %vm882_vm0 = vmmov (!%p341_p9), 0   ;;  %vm422_vm1 = vcmask (!%p341_p9), 1045504   ;;  %v406_v10 = vld [vmem:[%s1039_s3] sm:$0xf] (!%p341_p9) }
  0x2b   : > { %344 = sbr.rel (%p341_p9) target bundleno = 282 (0x11a), region = 147  ;;  %747 = vmatprep.subr.bf16.mxu0 (!%p341_p9), %v881_v6  ;;  %s720_s26 = sshll.u32 (!%p341_p9), %s347_s24, 3  ;;  %749 = vmatprep.mubr.msk.bf16.mxu0 (!%p341_p9), %vm882_vm0, %v881_v6  ;;  %vm418_vm2 = vcmask (!%p341_p9), 97280   ;;  %v725_v14 = vld [vmem:[%s1039_s3 + $0x4] sm:$0xf] (!%p341_p9) }
  0x2c   : > { %741 = vmatprep.subr.bf16.mxu1 (!%p341_p9), %v881_v6  ;;  %743 = vmatprep.mubr.msk.bf16.mxu1 (!%p341_p9), %vm882_vm0, %v881_v6  ;;  %s363_s27 = scalar_lea.vmem (!%p341_p9), [#allocation4], %s720_s26  ;;  %s356_s28 = scalar_lea.vmem (!%p341_p9), [#allocation3], %s720_s26  ;;  %v730_v15 = vld [vmem:[%s1039_s3 + $0x8] sm:$0xf] (!%p341_p9) }
  0x2d   : > { %v822_v7 = vld [vmem:[%s363_s27] sm:$0x3f] (!%p341_p9)   ;;  %v823_v8 = vld [vmem:[%s356_s28] sm:$0x3f] (!%p341_p9)   ;;  %s349_s15 = scalar_lea.vmem (!%p341_p9), [#allocation2], %s720_s26  ;;  %p397_p10 = scmp.lt.s32.totalorder (!%p341_p9), %s867_s18, 1 }
  0x2e   : > { %v475_v9 = vsel (!%p341_p9), %vm422_vm1, %v822_v7, 0  ;;  %v530_v11 = vsel (!%p341_p9), %vm422_vm1, %v823_v8, 0  ;;  %v824_v12 = vld [vmem:[%s349_s15] sm:$0x3f] (!%p341_p9)   ;;  %p399_p11 = scmp.lt.s32.totalorder (!%p341_p9), %s863_s17, 1 }
  0x2f   : > { %748 = vmatpush3.bf16.msra.mxu0 (!%p341_p9), %v475_v9  ;;  %v424_v13 = vsel (!%p341_p9), %vm422_vm1, %v824_v12, 0 }
  0x30   : > { %753 = vmatprep.subr.bf16.mxu0 (!%p341_p9), %v881_v6  ;;  %742 = vmatpush3.bf16.msra.mxu1 (!%p341_p9), %v424_v13 }
  0x32   : > { %750 = vmatmul.mubr.msk.bf16.vlgmr.msra.gmra.mrb[0].mxu0 %vm418_vm2, %v406_v10  ;;  %s1055_s18 = smov (!%p397_p10, %s867_s18), 1  ;;  %s1057_s17 = smov (!%p399_p11, %s863_s17), 1 }
  0x33   : > { %754 = vmatpush3.bf16.msra.mxu0 %v530_v11  ;;  %755 = vmatprep.mubr.msk.bf16.mxu0 %vm882_vm0, %v881_v6  ;;  %s723_s10 = sshll.u32 %s1055_s18, 1 }
  0x34   : > { %744 = vmatmul.mubr.msk.bf16.vlgmr.msra.gmra.mrb[0].mxu1 %vm418_vm2, %v725_v14  ;;  %s402_s11 = sadd.s32 %s723_s10, %s1057_s17 }
  0x35   : > { %s724_s12 = sshll.u32 %s402_s11, 2 }
  0x36   : > { %s404_s25 = scalar_lea.vmem %s1040_s4, %s724_s12 }
  0x3e   : > { %756 = vmatmul.mubr.msk.bf16.vlgmr.msra.gmra.mrb[0].mxu0 %vm418_vm2, %v730_v15 }
 0x107   : > { %v460_v16 = vpop.f32.mrb[0].mxu1 }
 0x108   : > { %v745_v17 = vpop.f32.mrb[1].mxu1 }
 0x109   : > { %v463_v18 = vpop.f32.mrb[2].mxu1 }
 0x10a   : > { %v746_v19 = vpop.f32.mrb[3].mxu1 }
 0x111   : > { %v566_v20 = vpop.f32.mrb[0].mxu0 }
 0x112   : > { %v759_v21 = vadd.f32 %v566_v20, %v460_v16  ;;  %v757_v22 = vpop.f32.mrb[1].mxu0 }
 0x113   : > { %v569_v23 = vpop.f32.mrb[2].mxu0 }
 0x114   : > { %vm573_vm3 = vcmp.gt.f32.partialorder %v759_v21, 0.0  ;;  %v574_v24 = vmul.f32 0.2, %v759_v21  ;;  %v758_v25 = vpop.f32.mrb[3].mxu0 }
 0x116   : > { %v575_v26 = vsel %vm573_vm3, %v759_v21, %v574_v24 }
 0x117   : > { %v576_v27 = vpack.c.bf16 %v575_v26, %v575_v26 }
 0x119   : > { %577 = vst [vmem:[%s404_s25] sm:$0xf] %v576_v27 }
 0x11a PF: > { %s14_s21 = sadd.s32 1, %s879_s21   ;;  %s1042_s15 = smov %s859_s16 }
 0x11b   : > { %p11_p12 = scmp.ge.s32.totalorder %s14_s21, 6   ;;  %s1043_s16 = smov %s963_s29 }
 0x11c   : > { %s1044_s17 = smov %s871_s19  ;;  %s1045_s18 = smov %s875_s20 }
 0x11d   : > { %s1046_s19 = smov %s1049_s22  ;;  %s1047_s20 = smov %s1053_s23 }
 0x11e   :  { %13 = sbr.rel (!%p11_p12) target bundleno = 4 (0x4), region = 212 }

// kernel: discriminator_forward.6
= control target key start
LH: loop header
LB: loop body
LE: loop exit
PB: predicated region body
PF: predicated region fallthrough
CT: control target
= control target key end

     0   :  { %s791_s15 = smov 0   ;;  %s793_s16 = smov 0   ;;  %s852_s0 = inlined_call_operand.vmem [shape: bf16[2,24,64], index: 0, kind: input, shape index: {}]   ;;  %s853_s1 = inlined_call_operand.vmem [shape: bf16[2,24,64], index: 1, kind: input, shape index: {}]   ;;  %s854_s2 = inlined_call_operand.vmem [shape: bf16[2,24,64], index: 2, kind: input, shape index: {}]   ;;  %s855_s3 = inlined_call_operand.vmem [shape: bf16[3,16,24], index: 3, kind: input, shape index: {}]   ;;  %s856_s4 = inlined_call_operand.vmem [shape: bf16[2,16,64], index: 4, kind: output, shape index: {}]  }
   0x1   :  { %s795_s17 = smov 0  }
   0x2 LB: > { %s26_s18 = sadd.s32 1, %s758_s16  ;;  %p636_p0 = scmp.ge.s32.totalorder %s762_s17, 1  ;;  %s762_s17 = sphi %s795_s17, %s14_s17   ;;  %s758_s16 = sphi %s793_s16, %s858_s16   ;;  %s754_s15 = sphi %s791_s15, %s857_s15  }
   0x3   : > { %p28_p1 = scmp.ge.s32.totalorder %s26_s18, 2  ;;  %p211_p2 = scmp.lt.s32.totalorder %s762_s17, 3 }
   0x5   : > { %s860_s18 = smov (%p28_p1, %s26_s18), 0  ;;  %p212_p3 = pnand %p636_p0, %p211_p2 }
   0x6   : > { %p259_p4 = scmp.lt.s32.totalorder (!%p212_p3), %s754_s15, 1  ;;  %v764_v0 = vmov (!%p212_p3), 0.0   ;;  %vm765_vm0 = vmmov (!%p212_p3), 0   ;;  %vm321_vm1 = vcmask (!%p212_p3), 1043456   ;;  %v733_v6 = vld [vmem:[%s855_s3] sm:$0xff] (!%p212_p3)   ;;  %vm317_vm2 = vcmask (!%p212_p3), 195584  }
   0x7   : > { %215 = sbr.rel (%p212_p3) target bundleno = 260 (0x104), region = 36  ;;  %682 = vmatprep.subr.bf16.mxu0 (!%p212_p3), %v764_v0  ;;  %686 = vmatprep.mubr.msk.bf16.mxu0 (!%p212_p3), %vm765_vm0, %v764_v0  ;;  %v738_v10 = vld [vmem:[%s855_s3 + $0x8] sm:$0xff] (!%p212_p3)   ;;  %v739_v12 = vld [vmem:[%s855_s3 + $0x10] sm:$0xff] (!%p212_p3)   ;;  %vm510_vm4 = vcmask (!%p212_p3), 519168  }
   0x8   : > { %674 = vmatprep.subr.bf16.mxu1 (!%p212_p3), %v764_v0  ;;  %678 = vmatprep.mubr.msk.bf16.mxu1 (!%p212_p3), %vm765_vm0, %v764_v0 }
   0xe   : > { %s862_s15 = smov (!%p259_p4, %s754_s15), 1 }
   0xf   : > { %s704_s19 = smul.u32 12, %s862_s15  ;;  %s662_s9 = sshll.u32 %s862_s15, 3 }
  0x10   : > { %s290_s12 = scalar_lea.vmem %s856_s4, %s662_s9 }
  0x11   : > { %s282_s22 = scalar_lea.vmem %s854_s2, %s704_s19  ;;  %s274_s25 = scalar_lea.vmem %s853_s1, %s704_s19 }
  0x12   : > { %v731_v1 = vld [vmem:[%s282_s22] sm:$0xff]   ;;  %s266_s28 = scalar_lea.vmem %s852_s0, %s704_s19  ;;  %v732_v2 = vld [vmem:[%s282_s22 + $0x8] ss:$0 sps:$4 sm:$0xff]  }
  0x13   : > { %683 = vmatpush3.bf16.msra.mxu0 %v731_v1  ;;  %v384_v3 = vsel %vm321_vm1, %v732_v2, 0  ;;  %v735_v4 = vld [vmem:[%s266_s28] sm:$0xff]   ;;  %v736_v5 = vld [vmem:[%s266_s28 + $0x8] ss:$0 sps:$4 sm:$0xff]  }
  0x14   : > { %684 = vmatprep.subr.bf16.mxu0 %v764_v0  ;;  %675 = vmatpush3.bf16.msra.mxu1 %v735_v4  ;;  %v734_v7 = vld [vmem:[%s274_s25] sm:$0xff]   ;;  %v323_v8 = vsel %vm321_vm1, %v736_v5, 0  ;;  %v737_v9 = vld [vmem:[%s274_s25 + $0x8] ss:$0 sps:$4 sm:$0xff]  }
  0x15   : > { %676 = vmatprep.subr.bf16.mxu1 %v764_v0  ;;  %v451_v11 = vsel %vm321_vm1, %v737_v9, 0 }
  0x17   : > { %685 = vmatpush3.bf16.msra.mxu0 %v384_v3 }
  0x18   : > { %690 = vmatprep.subr.bf16.mxu0 %v764_v0  ;;  %677 = vmatpush3.bf16.msra.mxu1 %v323_v8 }
  0x1a   : > { %687 = vmatmul.mubr.msk.bf16.vlgmr.msra.gmra.mrb[0].mxu0 %vm317_vm2, %v733_v6 }
  0x1b   : > { %691 = vmatpush3.bf16.msra.mxu0 %v734_v7  ;;  %694 = vmatprep.mubr.msk.bf16.mxu0 %vm765_vm0, %v764_v0 }
  0x1c   : > { %692 = vmatprep.subr.bf16.mxu0 %v764_v0  ;;  %679 = vmatmul.mubr.msk.bf16.vlgmr.msra.gmra.mrb[0].mxu1 %vm317_vm2, %v738_v10 }
  0x1f   : > { %693 = vmatpush3.bf16.msra.mxu0 %v451_v11 }
  0x26   : > { %695 = vmatmul.mubr.msk.bf16.vlgmr.msra.gmra.mrb[0].mxu0 %vm317_vm2, %v739_v12 }
  0xef   : > { %v359_v13 = vpop.f32.mrb[0].mxu1 }
  0xf0   : > { %v680_v14 = vpop.f32.mrb[1].mxu1 }
  0xf1   : > { %v362_v15 = vpop.f32.mrb[2].mxu1 }
  0xf2   : > { %v681_v16 = vpop.f32.mrb[3].mxu1 }
  0xf9   : > { %v487_v17 = vpop.f32.mrb[0].mxu0 }
  0xfa   : > { %v698_v18 = vadd.f32 %v487_v17, %v359_v13  ;;  %v696_v19 = vpop.f32.mrb[1].mxu0 }
  0xfb   : > { %v490_v20 = vpop.f32.mrb[2].mxu0 }
  0xfc   : > { %vm496_vm3 = vcmp.gt.f32.partialorder %v698_v18, 0.0  ;;  %v498_v21 = vmul.f32 0.2, %v698_v18  ;;  %v699_v22 = vadd.f32 %v490_v20, %v362_v15  ;;  %v697_v23 = vpop.f32.mrb[3].mxu0 }
  0xfe   : > { %v500_v24 = vsel %vm496_vm3, %v698_v18, %v498_v21  ;;  %vm497_vm5 = vcmp.gt.f32.partialorder %v699_v22, 0.0  ;;  %v499_v25 = vmul.f32 0.2, %v699_v22 }
  0xff   : > { %v663_v26 = vpack.c.bf16 %v500_v24, %v500_v24 }
 0x100   : > { %v501_v27 = vsel %vm497_vm5, %v699_v22, %v499_v25 }
 0x101   : > { %511 = vst.msk [vmem:[%s290_s12] sm:$0xf] %vm510_vm4, %v663_v26  ;;  %v664_v28 = vpack.c.bf16 %v501_v27, %v501_v27 }
 0x103   : > { %512 = vst.msk [vmem:[%s290_s12 + $0x4] sm:$0xf] %vm510_vm4, %v664_v28 }
 0x104 PF: > { %s14_s17 = sadd.s32 1, %s762_s17   ;;  %s857_s15 = smov %s758_s16 }
 0x105   : > { %p11_p5 = scmp.ge.s32.totalorder %s14_s17, 4   ;;  %s858_s16 = smov %s860_s18 }
 0x107   :  { %13 = sbr.rel (!%p11_p5) target bundleno = 2 (0x2), region = 74 }

// kernel: discriminator_forward.7
= control target key start
LH: loop header
LB: loop body
LE: loop exit
PB: predicated region body
PF: predicated region fallthrough
CT: control target
= control target key end

     0   :  { %vm80_vm0 = vcmask 392192   ;;  %vm611_vm4 = vcmask 130048   ;;  %s1131_s0 = inlined_call_operand.vmem [shape: bf16[2,48,16], index: 0, kind: input, shape index: {}]   ;;  %s1132_s3 = inlined_call_operand.vmem [shape: bf16[3,32,48], index: 3, kind: input, shape index: {}]   ;;  %s1133_s2 = inlined_call_operand.vmem [shape: bf16[2,48,16], index: 2, kind: input, shape index: {}]   ;;  %s1134_s1 = inlined_call_operand.vmem [shape: bf16[2,48,16], index: 1, kind: input, shape index: {}]   ;;  %s1135_s4 = inlined_call_operand.vmem [shape: f32[32,16], index: 4, kind: input, shape index: {}]   ;;  %s1136_s5 = inlined_call_operand.<no memory space> [shape: f32[1,1], index: 5, kind: input, shape index: {}]   ;;  %s1137_s6 = inlined_call_operand.vmem [shape: f32[2,1], index: 6, kind: output, shape index: {}]  }
   0x1   :  { %v902_v0 = vld [vmem:[%s1131_s0] sm:$0xff]   ;;  %v903_v1 = vld [vmem:[%s1131_s0 + $0x18] sm:$0xff]   ;;  %v904_v2 = vld [vmem:[%s1131_s0 + $0x8] sm:$0xff]  }
   0x2   :  { %820 = vmatprep.subr.bf16.mxu0 %v902_v0  ;;  %850 = vmatprep.subr.bf16.mxu1 %v903_v1  ;;  %v905_v3 = vld [vmem:[%s1131_s0 + $0x20] sm:$0xff]   ;;  %v906_v4 = vld [vmem:[%s1131_s0 + $0x10] sm:$0xff]   ;;  %v907_v5 = vld [vmem:[%s1131_s0 + $0x28] sm:$0xff]  }
   0x3   :  { %821 = vmatpush3.bf16.msra.mxu0 %v902_v0  ;;  %851 = vmatpush3.bf16.msra.mxu1 %v903_v1  ;;  %v908_v6 = vld [vmem:[%s1132_s3 + $0x10] sm:$0xff]   ;;  %v910_v7 = vld [vmem:[%s1133_s2] sm:$0xff]   ;;  %v911_v8 = vld [vmem:[%s1133_s2 + $0x18] sm:$0xff]  }
   0x4   :  { %822 = vmatprep.subr.bf16.mxu0 %v904_v2  ;;  %852 = vmatprep.subr.bf16.mxu1 %v905_v3  ;;  %v909_v9 = vld [vmem:[%s1132_s3 + $0x18] sm:$0xff]   ;;  %v912_v10 = vld [vmem:[%s1133_s2 + $0x8] sm:$0xff]   ;;  %v913_v11 = vld [vmem:[%s1133_s2 + $0x20] sm:$0xff]  }
   0x5   :  { %826 = vmatprep.mubr.msk.bf16.mxu0 %vm80_vm0, %v908_v6  ;;  %856 = vmatprep.mubr.msk.bf16.mxu1 %vm80_vm0, %v908_v6  ;;  %v916_v12 = vld [vmem:[%s1132_s3] sm:$0xff]   ;;  %v914_v13 = vld [vmem:[%s1133_s2 + $0x10] sm:$0xff]   ;;  %v915_v14 = vld [vmem:[%s1133_s2 + $0x28] sm:$0xff]  }
   0x6   :  { %v918_v15 = vld [vmem:[%s1134_s1] sm:$0xff]   ;;  %v919_v16 = vld [vmem:[%s1134_s1 + $0x18] sm:$0xff]   ;;  %v917_v17 = vld [vmem:[%s1132_s3 + $0x8] sm:$0xff]  }
   0x7   :  { %823 = vmatpush3.bf16.msra.mxu0 %v904_v2  ;;  %853 = vmatpush3.bf16.msra.mxu1 %v905_v3  ;;  %v920_v18 = vld [vmem:[%s1134_s1 + $0x8] sm:$0xff]   ;;  %v921_v19 = vld [vmem:[%s1134_s1 + $0x20] sm:$0xff]   ;;  %v922_v21 = vld [vmem:[%s1134_s1 + $0x10] sm:$0xff]  }
   0x8   :  { %824 = vmatprep.subr.bf16.mxu0 %v906_v4  ;;  %854 = vmatprep.subr.bf16.mxu1 %v907_v5  ;;  %v924_v20 = vld [vmem:[%s1132_s3 + $0x20] sm:$0xff]   ;;  %v923_v22 = vld [vmem:[%s1134_s1 + $0x28] sm:$0xff]   ;;  %v633_v2 = vld [vmem:[%s1135_s4 + $0x10] sm:$0xff] }
   0x9   :  { %v925_v23 = vld [vmem:[%s1132_s3 + $0x28] sm:$0xff]   ;;  %v631_v1 = vld [vmem:[%s1135_s4] sm:$0xff] }
   0xa   :  { %v632_v59 = vld [vmem:[%s1135_s4 + $0x8] sm:$0xff] }
   0xb   :  { %825 = vmatpush3.bf16.msra.mxu0 %v906_v4  ;;  %855 = vmatpush3.bf16.msra.mxu1 %v907_v5 }
   0xc   :  { %830 = vmatprep.subr.bf16.mxu0 %v910_v7  ;;  %860 = vmatprep.subr.bf16.mxu1 %v911_v8 }
   0xe   :  { %827 = vmatmul.mubr.msk.bf16.vlgmr.msra.gmra.mrb[0].mxu0 %vm80_vm0, %v909_v9  ;;  %857 = vmatmul.mubr.msk.bf16.vlgmr.msra.gmra.mrb[0].mxu1 %vm80_vm0, %v909_v9 }
   0xf   :  { %831 = vmatpush3.bf16.msra.mxu0 %v910_v7  ;;  %861 = vmatpush3.bf16.msra.mxu1 %v911_v8 }
  0x10   :  { %832 = vmatprep.subr.bf16.mxu0 %v912_v10  ;;  %862 = vmatprep.subr.bf16.mxu1 %v913_v11 }
  0x11   :  { %836 = vmatprep.mubr.msk.bf16.mxu0 %vm80_vm0, %v916_v12  ;;  %866 = vmatprep.mubr.msk.bf16.mxu1 %vm80_vm0, %v916_v12  ;;  %v634_v12 = vld [vmem:[%s1135_s4 + $0x18] sm:$0xff] }
  0x13   :  { %833 = vmatpush3.bf16.msra.mxu0 %v912_v10  ;;  %863 = vmatpush3.bf16.msra.mxu1 %v913_v11 }
  0x14   :  { %834 = vmatprep.subr.bf16.mxu0 %v914_v13  ;;  %864 = vmatprep.subr.bf16.mxu1 %v915_v14 }
  0x17   :  { %835 = vmatpush3.bf16.msra.mxu0 %v914_v13  ;;  %865 = vmatpush3.bf16.msra.mxu1 %v915_v14 }
  0x18   :  { %840 = vmatprep.subr.bf16.mxu0 %v918_v15  ;;  %870 = vmatprep.subr.bf16.mxu1 %v919_v16 }
  0x1a   :  { %837 = vmatmul.mubr.msk.bf16.vlgmr.msra.gmra.mrb[0].mxu0 %vm80_vm0, %v917_v17  ;;  %867 = vmatmul.mubr.msk.bf16.vlgmr.msra.gmra.mrb[0].mxu1 %vm80_vm0, %v917_v17 }
  0x1b   :  { %841 = vmatpush3.bf16.msra.mxu0 %v918_v15  ;;  %871 = vmatpush3.bf16.msra.mxu1 %v919_v16 }
  0x1c   :  { %842 = vmatprep.subr.bf16.mxu0 %v920_v18  ;;  %872 = vmatprep.subr.bf16.mxu1 %v921_v19 }
  0x1d   :  { %846 = vmatprep.mubr.msk.bf16.mxu0 %vm80_vm0, %v924_v20  ;;  %876 = vmatprep.mubr.msk.bf16.mxu1 %vm80_vm0, %v924_v20 }
  0x1f   :  { %843 = vmatpush3.bf16.msra.mxu0 %v920_v18  ;;  %873 = vmatpush3.bf16.msra.mxu1 %v921_v19 }
  0x20   :  { %844 = vmatprep.subr.bf16.mxu0 %v922_v21  ;;  %874 = vmatprep.subr.bf16.mxu1 %v923_v22 }
  0x23   :  { %845 = vmatpush3.bf16.msra.mxu0 %v922_v21  ;;  %875 = vmatpush3.bf16.msra.mxu1 %v923_v22 }
  0x26   :  { %847 = vmatmul.mubr.msk.bf16.vlgmr.msra.gmra.mrb[0].mxu0 %vm80_vm0, %v925_v23  ;;  %877 = vmatmul.mubr.msk.bf16.vlgmr.msra.gmra.mrb[0].mxu1 %vm80_vm0, %v925_v23 }
  0xf9   :  { %v1057_v24 = vpop.f32.mrb[0].mxu0  ;;  %v878_v25 = vpop.f32.mrb[0].mxu1 }
  0xfa   :  { %v1059_v26 = vpop.f32.mrb[1].mxu0  ;;  %v544_v27 = vadd.f32 %v878_v25, %v1057_v24  ;;  %v519_v28 = vpop.f32.mrb[1].mxu1  ;;  %v679_v33 = vmul.f32 0.2, %v878_v25  ;;  %vm675_vm2 = vcmp.gt.f32.partialorder %v878_v25, 0.0  ;;  %vm640_vm8 = vcmp.gt.f32.partialorder %v1057_v24, 0.0 }
  0xfb   :  { %v542_v29 = vadd.f32 %v519_v28, %v1059_v26  ;;  %v1063_v30 = vpop.f32.mrb[2].mxu0  ;;  %v879_v31 = vpop.f32.mrb[2].mxu1  ;;  %vm673_vm1 = vcmp.gt.f32.partialorder %v519_v28, 0.0  ;;  %v677_v38 = vmul.f32 0.2, %v519_v28  ;;  %vm638_vm5 = vcmp.gt.f32.partialorder %v1059_v26, 0.0 }
  0xfc   :  { %v549_v32 = vmul.f32 0.5, %v544_v27  ;;  %v545_v34 = vadd.f32 %v879_v31, %v1063_v30  ;;  %v296_v35 = vpop.f32.mrb[3].mxu0  ;;  %v522_v36 = vpop.f32.mrb[3].mxu1  ;;  %vm676_vm7 = vcmp.gt.f32.partialorder %v879_v31, 0.0  ;;  %v680_v3 = vmul.f32 0.2, %v879_v31 }
  0xfd   :  { %v547_v37 = vmul.f32 0.5, %v542_v29  ;;  %v543_v39 = vadd.f32 %v522_v36, %v296_v35  ;;  %vm639_vm3 = vcmp.gt.f32.partialorder %v296_v35, 0.0  ;;  %v643_v45 = vmul.f32 0.2, %v296_v35 }
  0xfe   :  { %v553_v40 = vsub.f32 %v1057_v24, %v549_v32  ;;  %v565_v41 = vsub.f32 %v878_v25, %v549_v32  ;;  %v550_v42 = vmul.f32 0.5, %v545_v34  ;;  %vm674_vm6 = vcmp.gt.f32.partialorder %v522_v36, 0.0 }
  0xff   :  { %v551_v43 = vsub.f32 %v1059_v26, %v547_v37  ;;  %v563_v44 = vsub.f32 %v519_v28, %v547_v37  ;;  %v548_v46 = vmul.f32 0.5, %v543_v39  ;;  %v678_v61 = vmul.f32 0.2, %v522_v36 }
 0x100   :  { %v557_v47 = vmul.f32 %v553_v40, %v553_v40  ;;  %v569_v48 = vmul.f32 %v565_v41, %v565_v41  ;;  %v554_v49 = vsub.f32 %v1063_v30, %v550_v42  ;;  %v566_v50 = vsub.f32 %v879_v31, %v550_v42 }
 0x101   :  { %v555_v51 = vmul.f32 %v551_v43, %v551_v43  ;;  %v567_v52 = vmul.f32 %v563_v44, %v563_v44  ;;  %v552_v53 = vsub.f32 %v296_v35, %v548_v46  ;;  %v564_v57 = vsub.f32 %v522_v36, %v548_v46 }
 0x102   :  { %v573_v54 = vadd.f32 %v569_v48, %v557_v47  ;;  %v558_v55 = vmul.f32 %v554_v49, %v554_v49  ;;  %v570_v56 = vmul.f32 %v566_v50, %v566_v50  ;;  %v682_v5 = vsel %vm674_vm6, %v522_v36, %v678_v61 }
 0x103   :  { %v571_v58 = vadd.f32 %v567_v52, %v555_v51  ;;  %v556_v60 = vmul.f32 %v552_v53, %v552_v53  ;;  %v568_v0 = vmul.f32 %v564_v57, %v564_v57  ;;  %v681_v6 = vsel %vm673_vm1, %v519_v28, %v677_v38 }
 0x104   :  { %v577_v62 = vmul.f32 0.5, %v573_v54  ;;  %v574_v63 = vadd.f32 %v570_v56, %v558_v55  ;;  %v683_v7 = vsel %vm675_vm2, %v878_v25, %v679_v33  ;;  %v686_v11 = vmul.f32 %v682_v5, %v632_v59 }
 0x105   :  { %v575_v4 = vmul.f32 0.5, %v571_v58  ;;  %v572_v10 = vadd.f32 %v568_v0, %v556_v60  ;;  %v684_v14 = vsel %vm676_vm7, %v879_v31, %v680_v3  ;;  %v685_v15 = vmul.f32 %v681_v6, %v631_v1 }
 0x106   :  { %v1082_v8 = vadd.f32 1e-08, %v577_v62  ;;  %v578_v9 = vmul.f32 0.5, %v574_v63  ;;  %v687_v16 = vmul.f32 %v683_v7, %v633_v2  ;;  %v642_v17 = vmul.f32 0.2, %v1059_v26 }
 0x107   :  { %v579_v13 = vadd.f32 1e-08, %v575_v4  ;;  %v647_v18 = vsel %vm639_vm3, %v296_v35, %v643_v45  ;;  %v576_v19 = vmul.f32 0.5, %v572_v10  ;;  %v690_v20 = vsel %vm611_vm4, %v686_v11, 0.0 }
 0x108   :  { %v1091_v21 = vadd.f32 1e-08, %v578_v9  ;;  %v688_v22 = vmul.f32 %v684_v14, %v634_v12  ;;  %v689_v23 = vsel %vm611_vm4, %v685_v15, 0.0  ;;  %v644_v25 = vmul.f32 0.2, %v1057_v24 }
 0x109   :  { %926 = vrsqrt.f32 %v579_v13  ;;  %v580_v27 = vadd.f32 1e-08, %v576_v19  ;;  %v691_v28 = vadd.f32 %v690_v20, %v689_v23  ;;  %v645_v29 = vmul.f32 0.2, %v1063_v30 }
 0x10a   :  { %v651_v31 = vmul.f32 %v647_v18, %v632_v59  ;;  %v692_v32 = vsel %vm611_vm4, %v687_v16, 0.0  ;;  %928 = vrsqrt.f32 %v1082_v8  ;;  %v646_v33 = vsel %vm638_vm5, %v1059_v26, %v642_v17 }
 0x10b   :  { %v693_v34 = vadd.f32 %v692_v32, %v691_v28  ;;  %930 = vrsqrt.f32 %v580_v27  ;;  %v694_v35 = vsel %vm611_vm4, %v688_v22, 0.0  ;;  %vm641_vm9 = vcmp.gt.f32.partialorder %v1063_v30, 0.0 }
 0x10c   :  { %932 = vrsqrt.f32 %v1091_v21  ;;  %v648_v37 = vsel %vm640_vm8, %v1057_v24, %v644_v25  ;;  %v649_v38 = vsel %vm641_vm9, %v1063_v30, %v645_v29  ;;  %v650_v39 = vmul.f32 %v646_v33, %v631_v1 }
 0x10d   :  { %v695_v36 = vadd.f32 %v694_v35, %v693_v34  ;;  %v655_v40 = vsel %vm611_vm4, %v651_v31, 0.0  ;;  %v652_v41 = vmul.f32 %v648_v37, %v633_v2  ;;  %v653_v42 = vmul.f32 %v649_v38, %v634_v12 }
 0x10e   :  { %v654_v26 = vsel %vm611_vm4, %v650_v39, 0.0  ;;  %vm585_vm10 = vcmp.eq.f32.partialorder %v579_v13, inf  ;;  %vm587_vm11 = vcmp.eq.f32.partialorder %v579_v13, 0.0  ;;  %v588_v50 = vand.u32 2147483648, %v579_v13 }
 0x10f   :  { %696 = vadd.xlane.f32.xlu1 %v695_v36  ;;  %v656_v43 = vadd.f32 %v655_v40, %v654_v26  ;;  %v657_v45 = vsel %vm611_vm4, %v652_v41, 0.0  ;;  %v659_v24 = vsel %vm611_vm4, %v653_v42, 0.0  ;;  %vm592_vm12 = vcmp.eq.f32.partialorder %v580_v27, inf }
 0x110   :  { %v595_v55 = vand.u32 2147483648, %v580_v27  ;;  %vm599_vm13 = vcmp.eq.f32.partialorder %v1082_v8, inf  ;;  %v602_v58 = vand.u32 2147483648, %v1082_v8  ;;  %vm594_vm14 = vcmp.eq.f32.partialorder %v580_v27, 0.0 }
 0x111   :  { %v658_v47 = vadd.f32 %v657_v45, %v656_v43  ;;  %vm601_vm15 = vcmp.eq.f32.partialorder %v1082_v8, 0.0  ;;  %vm606_vm0 = vcmp.eq.f32.partialorder %v1091_v21, inf  ;;  %v609_v0 = vand.u32 2147483648, %v1091_v21 }
 0x112   :  { %vm608_vm1 = vcmp.eq.f32.partialorder %v1091_v21, 0.0  ;;  %v11_v9 = vstv %s1136_s5  ;;  %v636_v34 = vlaneseq }
 0x113   :  { %v927_v44 = vpop.eup %926  ;;  %v660_v52 = vadd.f32 %v659_v24, %v658_v47  ;;  %12 = vst [vmem:[#allocation2] sm:$0x1] %v11_v9 }
 0x114   :  { %v584_v46 = vmul.f32 %v927_v44, %v579_v13  ;;  %v929_v48 = vpop.eup %928  ;;  %v637_v35 = vshrl.u32 %v636_v34, 7 }
 0x115   :  { %v931_v30 = vpop.eup %930  ;;  %v598_v51 = vmul.f32 %v929_v48, %v1082_v8 }
 0x116   :  { %v586_v49 = vsel %vm585_vm10, %v579_v13, %v584_v46  ;;  %v933_v53 = vpop.eup %932  ;;  %v591_v54 = vmul.f32 %v931_v30, %v580_v27  ;;  %v712_v39 = vsub.s32 0, %v637_v35  ;;  %vm670_vm2 = vcmp.eq.s32.totalorder %v637_v35, 0 }
 0x117   :  { %v589_v56 = vsel %vm587_vm11, %v588_v50, %v586_v49  ;;  %v600_v57 = vsel %vm599_vm13, %v1082_v8, %v598_v51  ;;  %v605_v59 = vmul.f32 %v933_v53, %v1091_v21  ;;  %vm705_vm3 = vcmp.eq.s32.totalorder %v637_v35, 1 }
 0x118   :  { %v593_v60 = vsel %vm592_vm12, %v580_v27, %v591_v54  ;;  %v603_v62 = vsel %vm601_vm15, %v602_v58, %v600_v57  ;;  %v612_v1 = vsel %vm611_vm4, %v589_v56, 0.0 }
 0x119   :  { %v596_v61 = vsel %vm594_vm14, %v595_v55, %v593_v60  ;;  %v607_v63 = vsel %vm606_vm0, %v1091_v21, %v605_v59  ;;  %v615_v5 = vsel %vm611_vm4, %v603_v62, 0.0 }
 0x11a   :  { %v613_v2 = vsel %vm611_vm4, %v596_v61, 0.0  ;;  %v610_v3 = vsel %vm608_vm1, %v609_v0, %v607_v63  ;;  %v635_v37 = vld [vmem:[#allocation2] sm:$0x1] }
 0x11b   :  { %v614_v4 = vadd.f32 %v613_v2, %v612_v1  ;;  %v617_v7 = vsel %vm611_vm4, %v610_v3, 0.0  ;;  %vm722_vm4 = vcmask 1024  }
 0x11d   :  { %v616_v6 = vadd.f32 %v615_v5, %v614_v4 }
 0x11f   :  { %v618_v8 = vadd.f32 %v617_v7, %v616_v6 }
 0x121   :  { %619 = vadd.xlane.f32.xlu0 %v618_v8 }
 0x125   :  { %661 = vadd.xlane.f32.xlu0 %v660_v52 }
 0x19c   :  { %v697_v10 = vpop.xlane.xlu1 %696 }
 0x19d   :  { %v698_v11 = vrot.slane %v697_v10, 4 }
 0x19f   :  { %v699_v12 = vadd.f32 %v698_v11, %v697_v10 }
 0x1a1   :  { %v700_v16 = vrot.slane %v699_v12, 2 }
 0x1a3   :  { %v701_v22 = vadd.f32 %v700_v16, %v699_v12 }
 0x1a5   :  { %v702_v29 = vrot.slane %v701_v22, 1 }
 0x1a7   :  { %v703_v33 = vadd.f32 %v702_v29, %v701_v22 }
 0x1ae   :  { %v620_v13 = vpop.xlane.xlu0 %619 }
 0x1af   :  { %v621_v14 = vrot.slane %v620_v13, 4 }
 0x1b1   :  { %v622_v15 = vadd.f32 %v621_v14, %v620_v13 }
 0x1b2   :  { %v662_v17 = vpop.xlane.xlu0 %661 }
 0x1b3   :  { %v623_v18 = vrot.slane %v622_v15, 2  ;;  %v663_v19 = vrot.slane %v662_v17, 4 }
 0x1b5   :  { %v664_v20 = vadd.f32 %v663_v19, %v662_v17  ;;  %v624_v21 = vadd.f32 %v623_v18, %v622_v15 }
 0x1b7   :  { %v665_v23 = vrot.slane %v664_v20, 2  ;;  %v625_v25 = vrot.slane %v624_v21, 1 }
 0x1b9   :  { %v666_v27 = vadd.f32 %v665_v23, %v664_v20  ;;  %v626_v28 = vadd.f32 %v625_v25, %v624_v21 }
 0x1bb   :  { %896 = vpush %v626_v28  ;;  %v667_v31 = vrot.slane %v666_v27, 1 }
 0x1bd   :  { %v668_v32 = vadd.f32 %v667_v31, %v666_v27 }
 0x1bf   :  { %898 = vpush %v668_v32 }
 0x1c0   :  { %900 = vpush %v703_v33 }
 0x1ec   :  { %s897_s5 = spop %896 }
 0x1ed   :  { %v628_v36 = vstv %s897_s5 }
 0x1ee   :  { %v630_v38 = vmul.f32 0.001953125, %v628_v36 }
 0x1f0   :  { %v708_v40 = vmul.f32 %v635_v37, %v630_v38  ;;  %s899_s25 = spop %898 }
 0x1f1   :  { %v671_v41 = vstv %s899_s25  ;;  %s901_s26 = spop %900 }
 0x1f2   :  { %v713_v42 = vrot.slane %v708_v40, %v712_v39  ;;  %v672_v26 = vsel %vm670_vm2, %v671_v41, 0.0  ;;  %v706_v43 = vstv %s901_s26 }
 0x1f3   :  { %v707_v44 = vsel %vm705_vm3, %v706_v43, %v672_v26 }
 0x1f4   :  { %v715_v45 = vadd.f32 %v713_v42, %v707_v44 }
 0x1f6   :  { %v716_v46 = vsub.f32 0.0, %v715_v45 }
 0x1f8   :  { %v717_v47 = vmul.f32 1.442695, %v716_v46 }
 0x1fa   :  { %934 = vpow2.f32 %v717_v47 }
 0x204   :  { %v935_v48 = vpop.eup %934 }
 0x205   :  { %v719_v24 = vadd.f32 1.0, %v935_v48 }
 0x207   :  { %936 = vrcp.f32 %v719_v24 }
 0x211   :  { %v937_v30 = vpop.eup %936 }
 0x212   :  { %723 = vst.msk [vmem:[%s1137_s6] sm:$0x3] %vm722_vm4, %v937_v30 }

</bundles_post_ra>
